<compile_context>
chip_gen: v7x
topology: tpu7x:2x2x1
jax: 0.10.0
libtpu: 0.0.40
codegen_flags: <defaults>
</compile_context>

<pallas_src>
import numpy as np
import jax
import jax.numpy as jnp
from jax.experimental import pallas as pl
from jax.experimental.pallas import tpu as pltpu

MAX_TAPS = 11  # kernel lengths are sampled from {7, 9, 11}


def sample_rocket_params(num_kernels, max_receptive_field, seed=0):
    """Deterministically mimic RocketConv1d.__init__ sampling (numpy instead of torch)."""
    rng = np.random.RandomState(seed)
    configs = []                                             # list of (kernel_length, dilation)
    weights = np.zeros((num_kernels, MAX_TAPS), np.float32)  # left-aligned, zero padded
    biases = np.zeros((num_kernels,), np.float32)
    for i in range(num_kernels):
        length = int(rng.choice([7, 9, 11]))
        upper = np.log2((max_receptive_field - 1) / (length - 1))
        dilation = int(2 ** rng.uniform(0.0, upper))
        w = rng.standard_normal(length).astype(np.float32)
        w = w - w.mean()                                     # mean-centred N(0,1) weights
        b = rng.uniform(-1.0, 1.0)                           # U(-1, 1) bias
        configs.append((length, dilation))
        weights[i, :length] = w
        biases[i] = np.float32(b)
    return configs, weights, biases


def _round_up(x, m):
    return (x + m - 1) // m * m


def make_rocket_kernel(configs, time_steps, pad_max, row_block):
    t = time_steps
    inv_t = 1.0 / float(t)

    def kernel(w_ref, b_ref, x_ref, out_ref):
        # w_ref  : SMEM (num_kernels*MAX_TAPS,) f32, zero padded past each kernel length
        # b_ref  : SMEM (num_kernels,)          f32
        # x_ref  : VMEM (row_block, time_steps) f32  (rows = batch*channels block)
        # out_ref: VMEM (row_block, 2*num_kernels) f32 -> [:, 2i]=ppv_i, [:, 2i+1]=max_i
        xb = x_ref[...]                                          # single hoisted base load
        zpad = jnp.zeros((row_block, pad_max), jnp.float32)
        xp = jnp.concatenate([zpad, xb, zpad], axis=1)           # in-register 'same' halo

        for i, (length, dilation) in enumerate(configs):         # static unroll (small demo)
            pad_i = dilation * (length - 1) // 2                 # 'same' pad (odd length)
            base = i * MAX_TAPS
            s0 = pad_max - pad_i
            # tap 0 initialises the accumulator (no zeros materialisation, no bias add)
            acc = w_ref[base] * xp[:, s0:s0 + t]
            for k in range(1, length):                           # static unroll over taps
                start = s0 + k * dilation
                acc = acc + w_ref[base + k] * xp[:, start:start + t]
            b = b_ref[i]
            # heaviside(acc + b, 0): 1 for acc > -b, 0 otherwise (bias folded into epilogue)
            ppv = jnp.sum((acc > -b).astype(jnp.float32), axis=1, keepdims=True) * inv_t
            mx = jnp.max(acc, axis=1, keepdims=True) + b
            out_ref[:, 2 * i:2 * i + 1] = ppv                    # narrow writes hit VMEM only;
            out_ref[:, 2 * i + 1:2 * i + 2] = mx                 # the HBM store is one dense block

    return kernel


def rocket_conv1d(x, configs, weights, biases):
    """Forward pass of RocketConv1d.  x: (batch, 1, channels, time) or (batch, channels, time)."""
    if x.ndim == 4:
        x = jnp.squeeze(x, axis=1)
    x = x.astype(jnp.float32)
    batch, channels, time_steps = x.shape
    num_kernels = len(configs)
    pad_max = max(d * (l - 1) // 2 for (l, d) in configs)

    # Fold batch & channels onto the sublane axis.
    rows = batch * channels
    x2 = x.reshape(rows, time_steps)
    row_block = 64 if rows >= 64 else _round_up(rows, 8)
    rows_pad = _round_up(rows, row_block)
    if rows_pad != rows:
        x2 = jnp.pad(x2, ((0, rows_pad - rows), (0, 0)))

    kernel = make_rocket_kernel(configs, time_steps, pad_max, row_block)
    out = pl.pallas_call(
        kernel,
        out_shape=jax.ShapeDtypeStruct((rows_pad, 2 * num_kernels), jnp.float32),
        grid=(rows_pad // row_block,),
        in_specs=[
            pl.BlockSpec(memory_space=pltpu.MemorySpace.SMEM),   # weights (1-D, flat)
            pl.BlockSpec(memory_space=pltpu.MemorySpace.SMEM),   # biases
            pl.BlockSpec((row_block, time_steps), lambda r: (r, 0)),
        ],
        out_specs=pl.BlockSpec((row_block, 2 * num_kernels), lambda r: (r, 0)),
        compiler_params=pltpu.CompilerParams(dimension_semantics=("parallel",)),
    )(jnp.asarray(weights.reshape(-1)), jnp.asarray(biases), x2)

    # (rows, 2*nk) -> (batch, channels, 2*nk); pure metadata reshape, no transpose copy.
    return out[:rows].reshape(batch, channels, 2 * num_kernels)


def reference_numpy(x, configs, weights, biases):
    """Pure-numpy reference reproducing the PyTorch forward semantics."""
    if x.ndim == 4:
        x = x[:, 0]
    x = np.asarray(x, np.float32)
    batch, channels, time_steps = x.shape
    nk = len(configs)
    out = np.zeros((batch, channels, 2 * nk), np.float32)
    for i, (length, dilation) in enumerate(configs):
        pad_i = dilation * (length - 1) // 2
        xp = np.pad(x, ((0, 0), (0, 0), (pad_i, pad_i)))
        conv = np.full((batch, channels, time_steps), biases[i], np.float32)
        for k in range(length):
            conv += weights[i, k] * xp[:, :, k * dilation:k * dilation + time_steps]
        out[..., 2 * i] = (conv > 0.0).mean(axis=-1)
        out[..., 2 * i + 1] = conv.max(axis=-1)
    return out


if __name__ == "__main__":
    batch, channels, time_steps = 2, 4, 128
    num_kernels, max_receptive_field = 6, 32

    configs, weights, biases = sample_rocket_params(num_kernels, max_receptive_field, seed=0)

    key = jax.random.PRNGKey(0)
    x = jax.random.normal(key, (batch, 1, channels, time_steps), dtype=jnp.float32)

    result = rocket_conv1d(x, configs, weights, biases)
    result = jax.block_until_ready(result)

    assert result.shape == (batch, channels, 2 * num_kernels)

    ref = reference_numpy(np.asarray(x), configs, weights, biases)
    res_np = np.asarray(result)
    # max features: exact up to fp32 reassociation (bias folded into epilogue)
    np.testing.assert_allclose(res_np[..., 1::2], ref[..., 1::2], rtol=1e-5, atol=1e-5)
    # ppv features: allow a couple of borderline (~0) samples of slack
    np.testing.assert_allclose(res_np[..., 0::2], ref[..., 0::2], atol=2.0 / time_steps)

    print("KERNEL_OK")
</pallas_src>

<mosaic_0001>
module attributes {stable_mosaic.version = 11 : i64} {
  func.func @kernel(%arg0: i32, %arg1: memref<66xf32, #tpu.memory_space<smem>>, %arg2: memref<6xf32, #tpu.memory_space<smem>>, %arg3: memref<8x128xf32, #tpu.memory_space<vmem>>, %arg4: memref<8x12xf32, #tpu.memory_space<vmem>>) attributes {dimension_semantics = [#tpu.dimension_semantics<parallel>], iteration_bounds = array<i64: 1>, scalar_prefetch = 0 : i64, scratch_operands = 0 : i64, tpu.core_type = #tpu.core_type<tc>, window_params = [{transform_indices = @transform_0, window_bounds = array<i64: 66>}, {transform_indices = @transform_1, window_bounds = array<i64: 6>}, {transform_indices = @transform_2, window_bounds = array<i64: 8, 128>}, {transform_indices = @transform_3, window_bounds = array<i64: 8, 12>}]} {
    %c0 = arith.constant 0 : index
    %c0_0 = arith.constant 0 : index
    %0 = vector.load %arg3[%c0, %c0_0] : memref<8x128xf32, #tpu.memory_space<vmem>>, vector<8x128xf32>
    %cst = arith.constant 0.000000e+00 : f32
    %1 = vector.broadcast %cst : f32 to vector<8x10xf32>
    %2 = tpu.concatenate %1, %0, %1 in 1 : vector<8x10xf32>, vector<8x128xf32>, vector<8x10xf32> -> vector<8x148xf32>
    %c0_1 = arith.constant 0 : index
    %3 = memref.load %arg1[%c0_1] : memref<66xf32, #tpu.memory_space<smem>>
    %4 = vector.extract_strided_slice %2 {offsets = [0, 4], sizes = [8, 128], strides = [1, 1]} : vector<8x148xf32> to vector<8x128xf32>
    %5 = vector.broadcast %3 : f32 to vector<8x128xf32>
    %6 = arith.mulf %5, %4 : vector<8x128xf32>
    %c1 = arith.constant 1 : index
    %7 = memref.load %arg1[%c1] : memref<66xf32, #tpu.memory_space<smem>>
    %8 = vector.extract_strided_slice %2 {offsets = [0, 6], sizes = [8, 128], strides = [1, 1]} : vector<8x148xf32> to vector<8x128xf32>
    %9 = vector.broadcast %7 : f32 to vector<8x128xf32>
    %10 = arith.mulf %9, %8 : vector<8x128xf32>
    %11 = arith.addf %6, %10 : vector<8x128xf32>
    %c2 = arith.constant 2 : index
    %12 = memref.load %arg1[%c2] : memref<66xf32, #tpu.memory_space<smem>>
    %13 = vector.extract_strided_slice %2 {offsets = [0, 8], sizes = [8, 128], strides = [1, 1]} : vector<8x148xf32> to vector<8x128xf32>
    %14 = vector.broadcast %12 : f32 to vector<8x128xf32>
    %15 = arith.mulf %14, %13 : vector<8x128xf32>
    %16 = arith.addf %11, %15 : vector<8x128xf32>
    %c3 = arith.constant 3 : index
    %17 = memref.load %arg1[%c3] : memref<66xf32, #tpu.memory_space<smem>>
    %18 = vector.extract_strided_slice %2 {offsets = [0, 10], sizes = [8, 128], strides = [1, 1]} : vector<8x148xf32> to vector<8x128xf32>
    %19 = vector.broadcast %17 : f32 to vector<8x128xf32>
    %20 = arith.mulf %19, %18 : vector<8x128xf32>
    %21 = arith.addf %16, %20 : vector<8x128xf32>
    %c4 = arith.constant 4 : index
    %22 = memref.load %arg1[%c4] : memref<66xf32, #tpu.memory_space<smem>>
    %23 = vector.extract_strided_slice %2 {offsets = [0, 12], sizes = [8, 128], strides = [1, 1]} : vector<8x148xf32> to vector<8x128xf32>
    %24 = vector.broadcast %22 : f32 to vector<8x128xf32>
    %25 = arith.mulf %24, %23 : vector<8x128xf32>
    %26 = arith.addf %21, %25 : vector<8x128xf32>
    %c5 = arith.constant 5 : index
    %27 = memref.load %arg1[%c5] : memref<66xf32, #tpu.memory_space<smem>>
    %28 = vector.extract_strided_slice %2 {offsets = [0, 14], sizes = [8, 128], strides = [1, 1]} : vector<8x148xf32> to vector<8x128xf32>
    %29 = vector.broadcast %27 : f32 to vector<8x128xf32>
    %30 = arith.mulf %29, %28 : vector<8x128xf32>
    %31 = arith.addf %26, %30 : vector<8x128xf32>
    %c6 = arith.constant 6 : index
    %32 = memref.load %arg1[%c6] : memref<66xf32, #tpu.memory_space<smem>>
    %33 = vector.extract_strided_slice %2 {offsets = [0, 16], sizes = [8, 128], strides = [1, 1]} : vector<8x148xf32> to vector<8x128xf32>
    %34 = vector.broadcast %32 : f32 to vector<8x128xf32>
    %35 = arith.mulf %34, %33 : vector<8x128xf32>
    %36 = arith.addf %31, %35 : vector<8x128xf32>
    %c0_2 = arith.constant 0 : index
    %37 = memref.load %arg2[%c0_2] : memref<6xf32, #tpu.memory_space<smem>>
    %cst_3 = arith.constant 0.000000e+00 : f32
    %38 = arith.subf %cst_3, %37 : f32
    %39 = vector.broadcast %38 : f32 to vector<8x128xf32>
    %40 = arith.cmpf ogt, %36, %39 : vector<8x128xf32>
    %41 = arith.extui %40 : vector<8x128xi1> to vector<8x128xi32>
    %42 = arith.sitofp %41 : vector<8x128xi32> to vector<8x128xf32>
    %cst_4 = arith.constant dense<0.000000e+00> : vector<8xf32>
    %43 = vector.multi_reduction <add>, %42, %cst_4 [1] : vector<8x128xf32> to vector<8xf32>
    %44 = vector.shape_cast %43 : vector<8xf32> to vector<8x1xf32>
    %cst_5 = arith.constant 7.812500e-03 : f32
    %45 = vector.broadcast %cst_5 : f32 to vector<8x1xf32>
    %46 = arith.mulf %44, %45 : vector<8x1xf32>
    %cst_6 = arith.constant dense<0xFF800000> : vector<8xf32>
    %47 = vector.multi_reduction <maximumf>, %36, %cst_6 [1] : vector<8x128xf32> to vector<8xf32>
    %48 = vector.shape_cast %47 : vector<8xf32> to vector<8x1xf32>
    %49 = vector.broadcast %37 : f32 to vector<8x1xf32>
    %50 = arith.addf %48, %49 : vector<8x1xf32>
    %c0_7 = arith.constant 0 : index
    %c0_8 = arith.constant 0 : index
    %51 = vector.load %arg4[%c0_7, %c0_8] : memref<8x12xf32, #tpu.memory_space<vmem>>, vector<8x1xf32>
    tpu.vector_store %arg4[%c0_7, %c0_8], %46 {strides = array<i32>} : memref<8x12xf32, #tpu.memory_space<vmem>>, vector<8x1xf32>,
    %c0_9 = arith.constant 0 : index
    %c1_10 = arith.constant 1 : index
    %52 = vector.load %arg4[%c0_9, %c1_10] : memref<8x12xf32, #tpu.memory_space<vmem>>, vector<8x1xf32>
    tpu.vector_store %arg4[%c0_9, %c1_10], %50 {strides = array<i32>} : memref<8x12xf32, #tpu.memory_space<vmem>>, vector<8x1xf32>,
    %c11 = arith.constant 11 : index
    %53 = memref.load %arg1[%c11] : memref<66xf32, #tpu.memory_space<smem>>
    %54 = vector.extract_strided_slice %2 {offsets = [0, 5], sizes = [8, 128], strides = [1, 1]} : vector<8x148xf32> to vector<8x128xf32>
    %55 = vector.broadcast %53 : f32 to vector<8x128xf32>
    %56 = arith.mulf %55, %54 : vector<8x128xf32>
    %c12 = arith.constant 12 : index
    %57 = memref.load %arg1[%c12] : memref<66xf32, #tpu.memory_space<smem>>
    %58 = vector.extract_strided_slice %2 {offsets = [0, 6], sizes = [8, 128], strides = [1, 1]} : vector<8x148xf32> to vector<8x128xf32>
    %59 = vector.broadcast %57 : f32 to vector<8x128xf32>
    %60 = arith.mulf %59, %58 : vector<8x128xf32>
    %61 = arith.addf %56, %60 : vector<8x128xf32>
    %c13 = arith.constant 13 : index
    %62 = memref.load %arg1[%c13] : memref<66xf32, #tpu.memory_space<smem>>
    %63 = vector.extract_strided_slice %2 {offsets = [0, 7], sizes = [8, 128], strides = [1, 1]} : vector<8x148xf32> to vector<8x128xf32>
    %64 = vector.broadcast %62 : f32 to vector<8x128xf32>
    %65 = arith.mulf %64, %63 : vector<8x128xf32>
    %66 = arith.addf %61, %65 : vector<8x128xf32>
    %c14 = arith.constant 14 : index
    %67 = memref.load %arg1[%c14] : memref<66xf32, #tpu.memory_space<smem>>
    %68 = vector.extract_strided_slice %2 {offsets = [0, 8], sizes = [8, 128], strides = [1, 1]} : vector<8x148xf32> to vector<8x128xf32>
    %69 = vector.broadcast %67 : f32 to vector<8x128xf32>
    %70 = arith.mulf %69, %68 : vector<8x128xf32>
    %71 = arith.addf %66, %70 : vector<8x128xf32>
    %c15 = arith.constant 15 : index
    %72 = memref.load %arg1[%c15] : memref<66xf32, #tpu.memory_space<smem>>
    %73 = vector.extract_strided_slice %2 {offsets = [0, 9], sizes = [8, 128], strides = [1, 1]} : vector<8x148xf32> to vector<8x128xf32>
    %74 = vector.broadcast %72 : f32 to vector<8x128xf32>
    %75 = arith.mulf %74, %73 : vector<8x128xf32>
    %76 = arith.addf %71, %75 : vector<8x128xf32>
    %c16 = arith.constant 16 : index
    %77 = memref.load %arg1[%c16] : memref<66xf32, #tpu.memory_space<smem>>
    %78 = vector.extract_strided_slice %2 {offsets = [0, 10], sizes = [8, 128], strides = [1, 1]} : vector<8x148xf32> to vector<8x128xf32>
    %79 = vector.broadcast %77 : f32 to vector<8x128xf32>
    %80 = arith.mulf %79, %78 : vector<8x128xf32>
    %81 = arith.addf %76, %80 : vector<8x128xf32>
    %c17 = arith.constant 17 : index
    %82 = memref.load %arg1[%c17] : memref<66xf32, #tpu.memory_space<smem>>
    %83 = vector.extract_strided_slice %2 {offsets = [0, 11], sizes = [8, 128], strides = [1, 1]} : vector<8x148xf32> to vector<8x128xf32>
    %84 = vector.broadcast %82 : f32 to vector<8x128xf32>
    %85 = arith.mulf %84, %83 : vector<8x128xf32>
    %86 = arith.addf %81, %85 : vector<8x128xf32>
    %c18 = arith.constant 18 : index
    %87 = memref.load %arg1[%c18] : memref<66xf32, #tpu.memory_space<smem>>
    %88 = vector.extract_strided_slice %2 {offsets = [0, 12], sizes = [8, 128], strides = [1, 1]} : vector<8x148xf32> to vector<8x128xf32>
    %89 = vector.broadcast %87 : f32 to vector<8x128xf32>
    %90 = arith.mulf %89, %88 : vector<8x128xf32>
    %91 = arith.addf %86, %90 : vector<8x128xf32>
    %c19 = arith.constant 19 : index
    %92 = memref.load %arg1[%c19] : memref<66xf32, #tpu.memory_space<smem>>
    %93 = vector.extract_strided_slice %2 {offsets = [0, 13], sizes = [8, 128], strides = [1, 1]} : vector<8x148xf32> to vector<8x128xf32>
    %94 = vector.broadcast %92 : f32 to vector<8x128xf32>
    %95 = arith.mulf %94, %93 : vector<8x128xf32>
    %96 = arith.addf %91, %95 : vector<8x128xf32>
    %c20 = arith.constant 20 : index
    %97 = memref.load %arg1[%c20] : memref<66xf32, #tpu.memory_space<smem>>
    %98 = vector.extract_strided_slice %2 {offsets = [0, 14], sizes = [8, 128], strides = [1, 1]} : vector<8x148xf32> to vector<8x128xf32>
    %99 = vector.broadcast %97 : f32 to vector<8x128xf32>
    %100 = arith.mulf %99, %98 : vector<8x128xf32>
    %101 = arith.addf %96, %100 : vector<8x128xf32>
    %c21 = arith.constant 21 : index
    %102 = memref.load %arg1[%c21] : memref<66xf32, #tpu.memory_space<smem>>
    %103 = vector.extract_strided_slice %2 {offsets = [0, 15], sizes = [8, 128], strides = [1, 1]} : vector<8x148xf32> to vector<8x128xf32>
    %104 = vector.broadcast %102 : f32 to vector<8x128xf32>
    %105 = arith.mulf %104, %103 : vector<8x128xf32>
    %106 = arith.addf %101, %105 : vector<8x128xf32>
    %c1_11 = arith.constant 1 : index
    %107 = memref.load %arg2[%c1_11] : memref<6xf32, #tpu.memory_space<smem>>
    %cst_12 = arith.constant 0.000000e+00 : f32
    %108 = arith.subf %cst_12, %107 : f32
    %109 = vector.broadcast %108 : f32 to vector<8x128xf32>
    %110 = arith.cmpf ogt, %106, %109 : vector<8x128xf32>
    %111 = arith.extui %110 : vector<8x128xi1> to vector<8x128xi32>
    %112 = arith.sitofp %111 : vector<8x128xi32> to vector<8x128xf32>
    %cst_13 = arith.constant dense<0.000000e+00> : vector<8xf32>
    %113 = vector.multi_reduction <add>, %112, %cst_13 [1] : vector<8x128xf32> to vector<8xf32>
    %114 = vector.shape_cast %113 : vector<8xf32> to vector<8x1xf32>
    %cst_14 = arith.constant 7.812500e-03 : f32
    %115 = vector.broadcast %cst_14 : f32 to vector<8x1xf32>
    %116 = arith.mulf %114, %115 : vector<8x1xf32>
    %cst_15 = arith.constant dense<0xFF800000> : vector<8xf32>
    %117 = vector.multi_reduction <maximumf>, %106, %cst_15 [1] : vector<8x128xf32> to vector<8xf32>
    %118 = vector.shape_cast %117 : vector<8xf32> to vector<8x1xf32>
    %119 = vector.broadcast %107 : f32 to vector<8x1xf32>
    %120 = arith.addf %118, %119 : vector<8x1xf32>
    %c0_16 = arith.constant 0 : index
    %c2_17 = arith.constant 2 : index
    %121 = vector.load %arg4[%c0_16, %c2_17] : memref<8x12xf32, #tpu.memory_space<vmem>>, vector<8x1xf32>
    tpu.vector_store %arg4[%c0_16, %c2_17], %116 {strides = array<i32>} : memref<8x12xf32, #tpu.memory_space<vmem>>, vector<8x1xf32>,
    %c0_18 = arith.constant 0 : index
    %c3_19 = arith.constant 3 : index
    %122 = vector.load %arg4[%c0_18, %c3_19] : memref<8x12xf32, #tpu.memory_space<vmem>>, vector<8x1xf32>
    tpu.vector_store %arg4[%c0_18, %c3_19], %120 {strides = array<i32>} : memref<8x12xf32, #tpu.memory_space<vmem>>, vector<8x1xf32>,
    %c22 = arith.constant 22 : index
    %123 = memref.load %arg1[%c22] : memref<66xf32, #tpu.memory_space<smem>>
    %124 = vector.extract_strided_slice %2 {offsets = [0, 0], sizes = [8, 128], strides = [1, 1]} : vector<8x148xf32> to vector<8x128xf32>
    %125 = vector.broadcast %123 : f32 to vector<8x128xf32>
    %126 = arith.mulf %125, %124 : vector<8x128xf32>
    %c23 = arith.constant 23 : index
    %127 = memref.load %arg1[%c23] : memref<66xf32, #tpu.memory_space<smem>>
    %128 = vector.extract_strided_slice %2 {offsets = [0, 2], sizes = [8, 128], strides = [1, 1]} : vector<8x148xf32> to vector<8x128xf32>
    %129 = vector.broadcast %127 : f32 to vector<8x128xf32>
    %130 = arith.mulf %129, %128 : vector<8x128xf32>
    %131 = arith.addf %126, %130 : vector<8x128xf32>
    %c24 = arith.constant 24 : index
    %132 = memref.load %arg1[%c24] : memref<66xf32, #tpu.memory_space<smem>>
    %133 = vector.extract_strided_slice %2 {offsets = [0, 4], sizes = [8, 128], strides = [1, 1]} : vector<8x148xf32> to vector<8x128xf32>
    %134 = vector.broadcast %132 : f32 to vector<8x128xf32>
    %135 = arith.mulf %134, %133 : vector<8x128xf32>
    %136 = arith.addf %131, %135 : vector<8x128xf32>
    %c25 = arith.constant 25 : index
    %137 = memref.load %arg1[%c25] : memref<66xf32, #tpu.memory_space<smem>>
    %138 = vector.extract_strided_slice %2 {offsets = [0, 6], sizes = [8, 128], strides = [1, 1]} : vector<8x148xf32> to vector<8x128xf32>
    %139 = vector.broadcast %137 : f32 to vector<8x128xf32>
    %140 = arith.mulf %139, %138 : vector<8x128xf32>
    %141 = arith.addf %136, %140 : vector<8x128xf32>
    %c26 = arith.constant 26 : index
    %142 = memref.load %arg1[%c26] : memref<66xf32, #tpu.memory_space<smem>>
    %143 = vector.extract_strided_slice %2 {offsets = [0, 8], sizes = [8, 128], strides = [1, 1]} : vector<8x148xf32> to vector<8x128xf32>
    %144 = vector.broadcast %142 : f32 to vector<8x128xf32>
    %145 = arith.mulf %144, %143 : vector<8x128xf32>
    %146 = arith.addf %141, %145 : vector<8x128xf32>
    %c27 = arith.constant 27 : index
    %147 = memref.load %arg1[%c27] : memref<66xf32, #tpu.memory_space<smem>>
    %148 = vector.extract_strided_slice %2 {offsets = [0, 10], sizes = [8, 128], strides = [1, 1]} : vector<8x148xf32> to vector<8x128xf32>
    %149 = vector.broadcast %147 : f32 to vector<8x128xf32>
    %150 = arith.mulf %149, %148 : vector<8x128xf32>
    %151 = arith.addf %146, %150 : vector<8x128xf32>
    %c28 = arith.constant 28 : index
    %152 = memref.load %arg1[%c28] : memref<66xf32, #tpu.memory_space<smem>>
    %153 = vector.extract_strided_slice %2 {offsets = [0, 12], sizes = [8, 128], strides = [1, 1]} : vector<8x148xf32> to vector<8x128xf32>
    %154 = vector.broadcast %152 : f32 to vector<8x128xf32>
    %155 = arith.mulf %154, %153 : vector<8x128xf32>
    %156 = arith.addf %151, %155 : vector<8x128xf32>
    %c29 = arith.constant 29 : index
    %157 = memref.load %arg1[%c29] : memref<66xf32, #tpu.memory_space<smem>>
    %158 = vector.extract_strided_slice %2 {offsets = [0, 14], sizes = [8, 128], strides = [1, 1]} : vector<8x148xf32> to vector<8x128xf32>
    %159 = vector.broadcast %157 : f32 to vector<8x128xf32>
    %160 = arith.mulf %159, %158 : vector<8x128xf32>
    %161 = arith.addf %156, %160 : vector<8x128xf32>
    %c30 = arith.constant 30 : index
    %162 = memref.load %arg1[%c30] : memref<66xf32, #tpu.memory_space<smem>>
    %163 = vector.extract_strided_slice %2 {offsets = [0, 16], sizes = [8, 128], strides = [1, 1]} : vector<8x148xf32> to vector<8x128xf32>
    %164 = vector.broadcast %162 : f32 to vector<8x128xf32>
    %165 = arith.mulf %164, %163 : vector<8x128xf32>
    %166 = arith.addf %161, %165 : vector<8x128xf32>
    %c31 = arith.constant 31 : index
    %167 = memref.load %arg1[%c31] : memref<66xf32, #tpu.memory_space<smem>>
    %168 = vector.extract_strided_slice %2 {offsets = [0, 18], sizes = [8, 128], strides = [1, 1]} : vector<8x148xf32> to vector<8x128xf32>
    %169 = vector.broadcast %167 : f32 to vector<8x128xf32>
    %170 = arith.mulf %169, %168 : vector<8x128xf32>
    %171 = arith.addf %166, %170 : vector<8x128xf32>
    %c32 = arith.constant 32 : index
    %172 = memref.load %arg1[%c32] : memref<66xf32, #tpu.memory_space<smem>>
    %173 = vector.extract_strided_slice %2 {offsets = [0, 20], sizes = [8, 128], strides = [1, 1]} : vector<8x148xf32> to vector<8x128xf32>
    %174 = vector.broadcast %172 : f32 to vector<8x128xf32>
    %175 = arith.mulf %174, %173 : vector<8x128xf32>
    %176 = arith.addf %171, %175 : vector<8x128xf32>
    %c2_20 = arith.constant 2 : index
    %177 = memref.load %arg2[%c2_20] : memref<6xf32, #tpu.memory_space<smem>>
    %cst_21 = arith.constant 0.000000e+00 : f32
    %178 = arith.subf %cst_21, %177 : f32
    %179 = vector.broadcast %178 : f32 to vector<8x128xf32>
    %180 = arith.cmpf ogt, %176, %179 : vector<8x128xf32>
    %181 = arith.extui %180 : vector<8x128xi1> to vector<8x128xi32>
    %182 = arith.sitofp %181 : vector<8x128xi32> to vector<8x128xf32>
    %cst_22 = arith.constant dense<0.000000e+00> : vector<8xf32>
    %183 = vector.multi_reduction <add>, %182, %cst_22 [1] : vector<8x128xf32> to vector<8xf32>
    %184 = vector.shape_cast %183 : vector<8xf32> to vector<8x1xf32>
    %cst_23 = arith.constant 7.812500e-03 : f32
    %185 = vector.broadcast %cst_23 : f32 to vector<8x1xf32>
    %186 = arith.mulf %184, %185 : vector<8x1xf32>
    %cst_24 = arith.constant dense<0xFF800000> : vector<8xf32>
    %187 = vector.multi_reduction <maximumf>, %176, %cst_24 [1] : vector<8x128xf32> to vector<8xf32>
    %188 = vector.shape_cast %187 : vector<8xf32> to vector<8x1xf32>
    %189 = vector.broadcast %177 : f32 to vector<8x1xf32>
    %190 = arith.addf %188, %189 : vector<8x1xf32>
    %c0_25 = arith.constant 0 : index
    %c4_26 = arith.constant 4 : index
    %191 = vector.load %arg4[%c0_25, %c4_26] : memref<8x12xf32, #tpu.memory_space<vmem>>, vector<8x1xf32>
    tpu.vector_store %arg4[%c0_25, %c4_26], %186 {strides = array<i32>} : memref<8x12xf32, #tpu.memory_space<vmem>>, vector<8x1xf32>,
    %c0_27 = arith.constant 0 : index
    %c5_28 = arith.constant 5 : index
    %192 = vector.load %arg4[%c0_27, %c5_28] : memref<8x12xf32, #tpu.memory_space<vmem>>, vector<8x1xf32>
    tpu.vector_store %arg4[%c0_27, %c5_28], %190 {strides = array<i32>} : memref<8x12xf32, #tpu.memory_space<vmem>>, vector<8x1xf32>,
    %c33 = arith.constant 33 : index
    %193 = memref.load %arg1[%c33] : memref<66xf32, #tpu.memory_space<smem>>
    %194 = vector.extract_strided_slice %2 {offsets = [0, 5], sizes = [8, 128], strides = [1, 1]} : vector<8x148xf32> to vector<8x128xf32>
    %195 = vector.broadcast %193 : f32 to vector<8x128xf32>
    %196 = arith.mulf %195, %194 : vector<8x128xf32>
    %c34 = arith.constant 34 : index
    %197 = memref.load %arg1[%c34] : memref<66xf32, #tpu.memory_space<smem>>
    %198 = vector.extract_strided_slice %2 {offsets = [0, 6], sizes = [8, 128], strides = [1, 1]} : vector<8x148xf32> to vector<8x128xf32>
    %199 = vector.broadcast %197 : f32 to vector<8x128xf32>
    %200 = arith.mulf %199, %198 : vector<8x128xf32>
    %201 = arith.addf %196, %200 : vector<8x128xf32>
    %c35 = arith.constant 35 : index
    %202 = memref.load %arg1[%c35] : memref<66xf32, #tpu.memory_space<smem>>
    %203 = vector.extract_strided_slice %2 {offsets = [0, 7], sizes = [8, 128], strides = [1, 1]} : vector<8x148xf32> to vector<8x128xf32>
    %204 = vector.broadcast %202 : f32 to vector<8x128xf32>
    %205 = arith.mulf %204, %203 : vector<8x128xf32>
    %206 = arith.addf %201, %205 : vector<8x128xf32>
    %c36 = arith.constant 36 : index
    %207 = memref.load %arg1[%c36] : memref<66xf32, #tpu.memory_space<smem>>
    %208 = vector.extract_strided_slice %2 {offsets = [0, 8], sizes = [8, 128], strides = [1, 1]} : vector<8x148xf32> to vector<8x128xf32>
    %209 = vector.broadcast %207 : f32 to vector<8x128xf32>
    %210 = arith.mulf %209, %208 : vector<8x128xf32>
    %211 = arith.addf %206, %210 : vector<8x128xf32>
    %c37 = arith.constant 37 : index
    %212 = memref.load %arg1[%c37] : memref<66xf32, #tpu.memory_space<smem>>
    %213 = vector.extract_strided_slice %2 {offsets = [0, 9], sizes = [8, 128], strides = [1, 1]} : vector<8x148xf32> to vector<8x128xf32>
    %214 = vector.broadcast %212 : f32 to vector<8x128xf32>
    %215 = arith.mulf %214, %213 : vector<8x128xf32>
    %216 = arith.addf %211, %215 : vector<8x128xf32>
    %c38 = arith.constant 38 : index
    %217 = memref.load %arg1[%c38] : memref<66xf32, #tpu.memory_space<smem>>
    %218 = vector.extract_strided_slice %2 {offsets = [0, 10], sizes = [8, 128], strides = [1, 1]} : vector<8x148xf32> to vector<8x128xf32>
    %219 = vector.broadcast %217 : f32 to vector<8x128xf32>
    %220 = arith.mulf %219, %218 : vector<8x128xf32>
    %221 = arith.addf %216, %220 : vector<8x128xf32>
    %c39 = arith.constant 39 : index
    %222 = memref.load %arg1[%c39] : memref<66xf32, #tpu.memory_space<smem>>
    %223 = vector.extract_strided_slice %2 {offsets = [0, 11], sizes = [8, 128], strides = [1, 1]} : vector<8x148xf32> to vector<8x128xf32>
    %224 = vector.broadcast %222 : f32 to vector<8x128xf32>
    %225 = arith.mulf %224, %223 : vector<8x128xf32>
    %226 = arith.addf %221, %225 : vector<8x128xf32>
    %c40 = arith.constant 40 : index
    %227 = memref.load %arg1[%c40] : memref<66xf32, #tpu.memory_space<smem>>
    %228 = vector.extract_strided_slice %2 {offsets = [0, 12], sizes = [8, 128], strides = [1, 1]} : vector<8x148xf32> to vector<8x128xf32>
    %229 = vector.broadcast %227 : f32 to vector<8x128xf32>
    %230 = arith.mulf %229, %228 : vector<8x128xf32>
    %231 = arith.addf %226, %230 : vector<8x128xf32>
    %c41 = arith.constant 41 : index
    %232 = memref.load %arg1[%c41] : memref<66xf32, #tpu.memory_space<smem>>
    %233 = vector.extract_strided_slice %2 {offsets = [0, 13], sizes = [8, 128], strides = [1, 1]} : vector<8x148xf32> to vector<8x128xf32>
    %234 = vector.broadcast %232 : f32 to vector<8x128xf32>
    %235 = arith.mulf %234, %233 : vector<8x128xf32>
    %236 = arith.addf %231, %235 : vector<8x128xf32>
    %c42 = arith.constant 42 : index
    %237 = memref.load %arg1[%c42] : memref<66xf32, #tpu.memory_space<smem>>
    %238 = vector.extract_strided_slice %2 {offsets = [0, 14], sizes = [8, 128], strides = [1, 1]} : vector<8x148xf32> to vector<8x128xf32>
    %239 = vector.broadcast %237 : f32 to vector<8x128xf32>
    %240 = arith.mulf %239, %238 : vector<8x128xf32>
    %241 = arith.addf %236, %240 : vector<8x128xf32>
    %c43 = arith.constant 43 : index
    %242 = memref.load %arg1[%c43] : memref<66xf32, #tpu.memory_space<smem>>
    %243 = vector.extract_strided_slice %2 {offsets = [0, 15], sizes = [8, 128], strides = [1, 1]} : vector<8x148xf32> to vector<8x128xf32>
    %244 = vector.broadcast %242 : f32 to vector<8x128xf32>
    %245 = arith.mulf %244, %243 : vector<8x128xf32>
    %246 = arith.addf %241, %245 : vector<8x128xf32>
    %c3_29 = arith.constant 3 : index
    %247 = memref.load %arg2[%c3_29] : memref<6xf32, #tpu.memory_space<smem>>
    %cst_30 = arith.constant 0.000000e+00 : f32
    %248 = arith.subf %cst_30, %247 : f32
    %249 = vector.broadcast %248 : f32 to vector<8x128xf32>
    %250 = arith.cmpf ogt, %246, %249 : vector<8x128xf32>
    %251 = arith.extui %250 : vector<8x128xi1> to vector<8x128xi32>
    %252 = arith.sitofp %251 : vector<8x128xi32> to vector<8x128xf32>
    %cst_31 = arith.constant dense<0.000000e+00> : vector<8xf32>
    %253 = vector.multi_reduction <add>, %252, %cst_31 [1] : vector<8x128xf32> to vector<8xf32>
    %254 = vector.shape_cast %253 : vector<8xf32> to vector<8x1xf32>
    %cst_32 = arith.constant 7.812500e-03 : f32
    %255 = vector.broadcast %cst_32 : f32 to vector<8x1xf32>
    %256 = arith.mulf %254, %255 : vector<8x1xf32>
    %cst_33 = arith.constant dense<0xFF800000> : vector<8xf32>
    %257 = vector.multi_reduction <maximumf>, %246, %cst_33 [1] : vector<8x128xf32> to vector<8xf32>
    %258 = vector.shape_cast %257 : vector<8xf32> to vector<8x1xf32>
    %259 = vector.broadcast %247 : f32 to vector<8x1xf32>
    %260 = arith.addf %258, %259 : vector<8x1xf32>
    %c0_34 = arith.constant 0 : index
    %c6_35 = arith.constant 6 : index
    %261 = vector.load %arg4[%c0_34, %c6_35] : memref<8x12xf32, #tpu.memory_space<vmem>>, vector<8x1xf32>
    tpu.vector_store %arg4[%c0_34, %c6_35], %256 {strides = array<i32>} : memref<8x12xf32, #tpu.memory_space<vmem>>, vector<8x1xf32>,
    %c0_36 = arith.constant 0 : index
    %c7 = arith.constant 7 : index
    %262 = vector.load %arg4[%c0_36, %c7] : memref<8x12xf32, #tpu.memory_space<vmem>>, vector<8x1xf32>
    tpu.vector_store %arg4[%c0_36, %c7], %260 {strides = array<i32>} : memref<8x12xf32, #tpu.memory_space<vmem>>, vector<8x1xf32>,
    %c44 = arith.constant 44 : index
    %263 = memref.load %arg1[%c44] : memref<66xf32, #tpu.memory_space<smem>>
    %264 = vector.extract_strided_slice %2 {offsets = [0, 2], sizes = [8, 128], strides = [1, 1]} : vector<8x148xf32> to vector<8x128xf32>
    %265 = vector.broadcast %263 : f32 to vector<8x128xf32>
    %266 = arith.mulf %265, %264 : vector<8x128xf32>
    %c45 = arith.constant 45 : index
    %267 = memref.load %arg1[%c45] : memref<66xf32, #tpu.memory_space<smem>>
    %268 = vector.extract_strided_slice %2 {offsets = [0, 4], sizes = [8, 128], strides = [1, 1]} : vector<8x148xf32> to vector<8x128xf32>
    %269 = vector.broadcast %267 : f32 to vector<8x128xf32>
    %270 = arith.mulf %269, %268 : vector<8x128xf32>
    %271 = arith.addf %266, %270 : vector<8x128xf32>
    %c46 = arith.constant 46 : index
    %272 = memref.load %arg1[%c46] : memref<66xf32, #tpu.memory_space<smem>>
    %273 = vector.extract_strided_slice %2 {offsets = [0, 6], sizes = [8, 128], strides = [1, 1]} : vector<8x148xf32> to vector<8x128xf32>
    %274 = vector.broadcast %272 : f32 to vector<8x128xf32>
    %275 = arith.mulf %274, %273 : vector<8x128xf32>
    %276 = arith.addf %271, %275 : vector<8x128xf32>
    %c47 = arith.constant 47 : index
    %277 = memref.load %arg1[%c47] : memref<66xf32, #tpu.memory_space<smem>>
    %278 = vector.extract_strided_slice %2 {offsets = [0, 8], sizes = [8, 128], strides = [1, 1]} : vector<8x148xf32> to vector<8x128xf32>
    %279 = vector.broadcast %277 : f32 to vector<8x128xf32>
    %280 = arith.mulf %279, %278 : vector<8x128xf32>
    %281 = arith.addf %276, %280 : vector<8x128xf32>
    %c48 = arith.constant 48 : index
    %282 = memref.load %arg1[%c48] : memref<66xf32, #tpu.memory_space<smem>>
    %283 = vector.extract_strided_slice %2 {offsets = [0, 10], sizes = [8, 128], strides = [1, 1]} : vector<8x148xf32> to vector<8x128xf32>
    %284 = vector.broadcast %282 : f32 to vector<8x128xf32>
    %285 = arith.mulf %284, %283 : vector<8x128xf32>
    %286 = arith.addf %281, %285 : vector<8x128xf32>
    %c49 = arith.constant 49 : index
    %287 = memref.load %arg1[%c49] : memref<66xf32, #tpu.memory_space<smem>>
    %288 = vector.extract_strided_slice %2 {offsets = [0, 12], sizes = [8, 128], strides = [1, 1]} : vector<8x148xf32> to vector<8x128xf32>
    %289 = vector.broadcast %287 : f32 to vector<8x128xf32>
    %290 = arith.mulf %289, %288 : vector<8x128xf32>
    %291 = arith.addf %286, %290 : vector<8x128xf32>
    %c50 = arith.constant 50 : index
    %292 = memref.load %arg1[%c50] : memref<66xf32, #tpu.memory_space<smem>>
    %293 = vector.extract_strided_slice %2 {offsets = [0, 14], sizes = [8, 128], strides = [1, 1]} : vector<8x148xf32> to vector<8x128xf32>
    %294 = vector.broadcast %292 : f32 to vector<8x128xf32>
    %295 = arith.mulf %294, %293 : vector<8x128xf32>
    %296 = arith.addf %291, %295 : vector<8x128xf32>
    %c51 = arith.constant 51 : index
    %297 = memref.load %arg1[%c51] : memref<66xf32, #tpu.memory_space<smem>>
    %298 = vector.extract_strided_slice %2 {offsets = [0, 16], sizes = [8, 128], strides = [1, 1]} : vector<8x148xf32> to vector<8x128xf32>
    %299 = vector.broadcast %297 : f32 to vector<8x128xf32>
    %300 = arith.mulf %299, %298 : vector<8x128xf32>
    %301 = arith.addf %296, %300 : vector<8x128xf32>
    %c52 = arith.constant 52 : index
    %302 = memref.load %arg1[%c52] : memref<66xf32, #tpu.memory_space<smem>>
    %303 = vector.extract_strided_slice %2 {offsets = [0, 18], sizes = [8, 128], strides = [1, 1]} : vector<8x148xf32> to vector<8x128xf32>
    %304 = vector.broadcast %302 : f32 to vector<8x128xf32>
    %305 = arith.mulf %304, %303 : vector<8x128xf32>
    %306 = arith.addf %301, %305 : vector<8x128xf32>
    %c4_37 = arith.constant 4 : index
    %307 = memref.load %arg2[%c4_37] : memref<6xf32, #tpu.memory_space<smem>>
    %cst_38 = arith.constant 0.000000e+00 : f32
    %308 = arith.subf %cst_38, %307 : f32
    %309 = vector.broadcast %308 : f32 to vector<8x128xf32>
    %310 = arith.cmpf ogt, %306, %309 : vector<8x128xf32>
    %311 = arith.extui %310 : vector<8x128xi1> to vector<8x128xi32>
    %312 = arith.sitofp %311 : vector<8x128xi32> to vector<8x128xf32>
    %cst_39 = arith.constant dense<0.000000e+00> : vector<8xf32>
    %313 = vector.multi_reduction <add>, %312, %cst_39 [1] : vector<8x128xf32> to vector<8xf32>
    %314 = vector.shape_cast %313 : vector<8xf32> to vector<8x1xf32>
    %cst_40 = arith.constant 7.812500e-03 : f32
    %315 = vector.broadcast %cst_40 : f32 to vector<8x1xf32>
    %316 = arith.mulf %314, %315 : vector<8x1xf32>
    %cst_41 = arith.constant dense<0xFF800000> : vector<8xf32>
    %317 = vector.multi_reduction <maximumf>, %306, %cst_41 [1] : vector<8x128xf32> to vector<8xf32>
    %318 = vector.shape_cast %317 : vector<8xf32> to vector<8x1xf32>
    %319 = vector.broadcast %307 : f32 to vector<8x1xf32>
    %320 = arith.addf %318, %319 : vector<8x1xf32>
    %c0_42 = arith.constant 0 : index
    %c8 = arith.constant 8 : index
    %321 = vector.load %arg4[%c0_42, %c8] : memref<8x12xf32, #tpu.memory_space<vmem>>, vector<8x1xf32>
    tpu.vector_store %arg4[%c0_42, %c8], %316 {strides = array<i32>} : memref<8x12xf32, #tpu.memory_space<vmem>>, vector<8x1xf32>,
    %c0_43 = arith.constant 0 : index
    %c9 = arith.constant 9 : index
    %322 = vector.load %arg4[%c0_43, %c9] : memref<8x12xf32, #tpu.memory_space<vmem>>, vector<8x1xf32>
    tpu.vector_store %arg4[%c0_43, %c9], %320 {strides = array<i32>} : memref<8x12xf32, #tpu.memory_space<vmem>>, vector<8x1xf32>,
    %c55 = arith.constant 55 : index
    %323 = memref.load %arg1[%c55] : memref<66xf32, #tpu.memory_space<smem>>
    %324 = vector.extract_strided_slice %2 {offsets = [0, 0], sizes = [8, 128], strides = [1, 1]} : vector<8x148xf32> to vector<8x128xf32>
    %325 = vector.broadcast %323 : f32 to vector<8x128xf32>
    %326 = arith.mulf %325, %324 : vector<8x128xf32>
    %c56 = arith.constant 56 : index
    %327 = memref.load %arg1[%c56] : memref<66xf32, #tpu.memory_space<smem>>
    %328 = vector.extract_strided_slice %2 {offsets = [0, 2], sizes = [8, 128], strides = [1, 1]} : vector<8x148xf32> to vector<8x128xf32>
    %329 = vector.broadcast %327 : f32 to vector<8x128xf32>
    %330 = arith.mulf %329, %328 : vector<8x128xf32>
    %331 = arith.addf %326, %330 : vector<8x128xf32>
    %c57 = arith.constant 57 : index
    %332 = memref.load %arg1[%c57] : memref<66xf32, #tpu.memory_space<smem>>
    %333 = vector.extract_strided_slice %2 {offsets = [0, 4], sizes = [8, 128], strides = [1, 1]} : vector<8x148xf32> to vector<8x128xf32>
    %334 = vector.broadcast %332 : f32 to vector<8x128xf32>
    %335 = arith.mulf %334, %333 : vector<8x128xf32>
    %336 = arith.addf %331, %335 : vector<8x128xf32>
    %c58 = arith.constant 58 : index
    %337 = memref.load %arg1[%c58] : memref<66xf32, #tpu.memory_space<smem>>
    %338 = vector.extract_strided_slice %2 {offsets = [0, 6], sizes = [8, 128], strides = [1, 1]} : vector<8x148xf32> to vector<8x128xf32>
    %339 = vector.broadcast %337 : f32 to vector<8x128xf32>
    %340 = arith.mulf %339, %338 : vector<8x128xf32>
    %341 = arith.addf %336, %340 : vector<8x128xf32>
    %c59 = arith.constant 59 : index
    %342 = memref.load %arg1[%c59] : memref<66xf32, #tpu.memory_space<smem>>
    %343 = vector.extract_strided_slice %2 {offsets = [0, 8], sizes = [8, 128], strides = [1, 1]} : vector<8x148xf32> to vector<8x128xf32>
    %344 = vector.broadcast %342 : f32 to vector<8x128xf32>
    %345 = arith.mulf %344, %343 : vector<8x128xf32>
    %346 = arith.addf %341, %345 : vector<8x128xf32>
    %c60 = arith.constant 60 : index
    %347 = memref.load %arg1[%c60] : memref<66xf32, #tpu.memory_space<smem>>
    %348 = vector.extract_strided_slice %2 {offsets = [0, 10], sizes = [8, 128], strides = [1, 1]} : vector<8x148xf32> to vector<8x128xf32>
    %349 = vector.broadcast %347 : f32 to vector<8x128xf32>
    %350 = arith.mulf %349, %348 : vector<8x128xf32>
    %351 = arith.addf %346, %350 : vector<8x128xf32>
    %c61 = arith.constant 61 : index
    %352 = memref.load %arg1[%c61] : memref<66xf32, #tpu.memory_space<smem>>
    %353 = vector.extract_strided_slice %2 {offsets = [0, 12], sizes = [8, 128], strides = [1, 1]} : vector<8x148xf32> to vector<8x128xf32>
    %354 = vector.broadcast %352 : f32 to vector<8x128xf32>
    %355 = arith.mulf %354, %353 : vector<8x128xf32>
    %356 = arith.addf %351, %355 : vector<8x128xf32>
    %c62 = arith.constant 62 : index
    %357 = memref.load %arg1[%c62] : memref<66xf32, #tpu.memory_space<smem>>
    %358 = vector.extract_strided_slice %2 {offsets = [0, 14], sizes = [8, 128], strides = [1, 1]} : vector<8x148xf32> to vector<8x128xf32>
    %359 = vector.broadcast %357 : f32 to vector<8x128xf32>
    %360 = arith.mulf %359, %358 : vector<8x128xf32>
    %361 = arith.addf %356, %360 : vector<8x128xf32>
    %c63 = arith.constant 63 : index
    %362 = memref.load %arg1[%c63] : memref<66xf32, #tpu.memory_space<smem>>
    %363 = vector.extract_strided_slice %2 {offsets = [0, 16], sizes = [8, 128], strides = [1, 1]} : vector<8x148xf32> to vector<8x128xf32>
    %364 = vector.broadcast %362 : f32 to vector<8x128xf32>
    %365 = arith.mulf %364, %363 : vector<8x128xf32>
    %366 = arith.addf %361, %365 : vector<8x128xf32>
    %c64 = arith.constant 64 : index
    %367 = memref.load %arg1[%c64] : memref<66xf32, #tpu.memory_space<smem>>
    %368 = vector.extract_strided_slice %2 {offsets = [0, 18], sizes = [8, 128], strides = [1, 1]} : vector<8x148xf32> to vector<8x128xf32>
    %369 = vector.broadcast %367 : f32 to vector<8x128xf32>
    %370 = arith.mulf %369, %368 : vector<8x128xf32>
    %371 = arith.addf %366, %370 : vector<8x128xf32>
    %c65 = arith.constant 65 : index
    %372 = memref.load %arg1[%c65] : memref<66xf32, #tpu.memory_space<smem>>
    %373 = vector.extract_strided_slice %2 {offsets = [0, 20], sizes = [8, 128], strides = [1, 1]} : vector<8x148xf32> to vector<8x128xf32>
    %374 = vector.broadcast %372 : f32 to vector<8x128xf32>
    %375 = arith.mulf %374, %373 : vector<8x128xf32>
    %376 = arith.addf %371, %375 : vector<8x128xf32>
    %c5_44 = arith.constant 5 : index
    %377 = memref.load %arg2[%c5_44] : memref<6xf32, #tpu.memory_space<smem>>
    %cst_45 = arith.constant 0.000000e+00 : f32
    %378 = arith.subf %cst_45, %377 : f32
    %379 = vector.broadcast %378 : f32 to vector<8x128xf32>
    %380 = arith.cmpf ogt, %376, %379 : vector<8x128xf32>
    %381 = arith.extui %380 : vector<8x128xi1> to vector<8x128xi32>
    %382 = arith.sitofp %381 : vector<8x128xi32> to vector<8x128xf32>
    %cst_46 = arith.constant dense<0.000000e+00> : vector<8xf32>
    %383 = vector.multi_reduction <add>, %382, %cst_46 [1] : vector<8x128xf32> to vector<8xf32>
    %384 = vector.shape_cast %383 : vector<8xf32> to vector<8x1xf32>
    %cst_47 = arith.constant 7.812500e-03 : f32
    %385 = vector.broadcast %cst_47 : f32 to vector<8x1xf32>
    %386 = arith.mulf %384, %385 : vector<8x1xf32>
    %cst_48 = arith.constant dense<0xFF800000> : vector<8xf32>
    %387 = vector.multi_reduction <maximumf>, %376, %cst_48 [1] : vector<8x128xf32> to vector<8xf32>
    %388 = vector.shape_cast %387 : vector<8xf32> to vector<8x1xf32>
    %389 = vector.broadcast %377 : f32 to vector<8x1xf32>
    %390 = arith.addf %388, %389 : vector<8x1xf32>
    %c0_49 = arith.constant 0 : index
    %c10 = arith.constant 10 : index
    %391 = vector.load %arg4[%c0_49, %c10] : memref<8x12xf32, #tpu.memory_space<vmem>>, vector<8x1xf32>
    tpu.vector_store %arg4[%c0_49, %c10], %386 {strides = array<i32>} : memref<8x12xf32, #tpu.memory_space<vmem>>, vector<8x1xf32>,
    %c0_50 = arith.constant 0 : index
    %c11_51 = arith.constant 11 : index
    %392 = vector.load %arg4[%c0_50, %c11_51] : memref<8x12xf32, #tpu.memory_space<vmem>>, vector<8x1xf32>
    tpu.vector_store %arg4[%c0_50, %c11_51], %390 {strides = array<i32>} : memref<8x12xf32, #tpu.memory_space<vmem>>, vector<8x1xf32>,
    return
  }
  func.func @transform_0(%arg0: i32) -> i32 {
    %c0_i32 = arith.constant 0 : i32
    %c0_i32_0 = arith.constant 0 : i32
    return %c0_i32 : i32
  }
  func.func @transform_1(%arg0: i32) -> i32 {
    %c0_i32 = arith.constant 0 : i32
    %c0_i32_0 = arith.constant 0 : i32
    return %c0_i32 : i32
  }
  func.func @transform_2(%arg0: i32) -> (i32, i32) {
    %c0_i32 = arith.constant 0 : i32
    %c0_i32_0 = arith.constant 0 : i32
    return %arg0, %c0_i32 : i32, i32
  }
  func.func @transform_3(%arg0: i32) -> (i32, i32) {
    %c0_i32 = arith.constant 0 : i32
    %c0_i32_0 = arith.constant 0 : i32
    return %arg0, %c0_i32 : i32, i32
  }
}

</mosaic_0001>

<bundles_post_ra>
// kernel: tpu_custom_call.1
= control target key start
LH: loop header
LB: loop body
LE: loop exit
PB: predicated region body
PF: predicated region fallthrough
CT: control target
= control target key end

     0   :  { %8 = vsyncpa [#allocation5], 0  ;;  %s1793_s0 = inlined_call_operand.hbm [shape: f32[66], index: 0, kind: input, shape index: {}]   ;;  %s1794_s1 = inlined_call_operand.vmem [shape: f32[6], index: 1, kind: input, shape index: {}]   ;;  %s1795_s2 = inlined_call_operand.hbm [shape: f32[8,128], index: 2, kind: input, shape index: {}]   ;;  %s1796_s3 = inlined_call_operand.hbm [shape: f32[8,12], index: 3, kind: output, shape index: {}]  }
   0x1   :  { %9 = vsyncpa [#allocation6], 0 }
   0x2   :  { %10 = vsyncpa [#allocation3], 0 }
   0x3   :  { %11 = vsyncpa [#allocation4], 0  ;;  %s26_s14 = sshll.u32 %s1794_s1, 4  ;;  %s1161_s17 = scalar_lea.hbm %s1793_s0, 16  ;;  %s27_s14 = int_to_ptr.vmem [resolvable:$true] %s26_s14 }
   0x4   :  { %p1162_p0 = scmp.ne.s32.totalorder %s1793_s0, %s1161_s17  ;;  %p1165_p1 = scmp.lt.u32.totalorder %s1161_s17, %s1793_s0 }
   0x6   :  { %p1167_p2 = pnand %p1165_p1, %p1162_p0 }
   0x8   :  { %1170 = shalt.err (!%p1167_p2)
}
   0x9   :  { %s1235_s22 = smov [#allocation2]   ;;  %s1171_s1 = scalar_lea.vmem %s27_s14, 16 }
   0xa   :  { %19 = dma.hbm_to_smem %s1793_s0, 16, %s1235_s22, [#allocation5]  }
   0xb   :  { %p1172_p3 = scmp.ne.s32.totalorder %s27_s14, %s1171_s1  ;;  %p1176_p4 = scmp.lt.s32.totalorder %s27_s14, %s27_s14 }
   0xc   :  { %p1177_p5 = scmp.lt.s32.totalorder %s1171_s1, %s1171_s1 }
   0xe   :  { %p1178_p6 = por %p1177_p5, %p1176_p4 }
  0x10   :  { %p1179_p7 = pnand %p1178_p6, %p1172_p3 }
  0x12   :  { %1182 = shalt.err (!%p1179_p7)
}
  0x13   :  { %s1236_s25 = smov [#allocation7]   ;;  %s1237_s26 = smov [#allocation8]  }
  0x14   :  { %29 = dma.vmem_to_smem %s27_s14, 16, %s1236_s25, [#allocation6]  }
  0x15   :  { %s36_s27 = sshll.u32 %s1237_s26, 4  ;;  %s1183_s30 = scalar_lea.hbm %s1795_s2, 128  ;;  %s37_s27 = int_to_ptr.vmem [resolvable:$true] %s36_s27 }
  0x16   :  { %p1184_p8 = scmp.ne.s32.totalorder %s1795_s2, %s1183_s30  ;;  %p1187_p9 = scmp.lt.u32.totalorder %s1183_s30, %s1795_s2 }
  0x18   :  { %p1189_p10 = pnand %p1187_p9, %p1184_p8 }
  0x1a   :  { %1192 = shalt.err (!%p1189_p10)
}
  0x1b   :  { %s1193_s7 = scalar_lea.vmem %s37_s27, 128  ;;  %p1198_p12 = scmp.lt.s32.totalorder %s37_s27, %s37_s27 }
  0x1c   :  { %p1194_p11 = scmp.ne.s32.totalorder %s37_s27, %s1193_s7  ;;  %p1199_p13 = scmp.lt.s32.totalorder %s1193_s7, %s1193_s7 }
  0x1e   :  { %p1200_p0 = por %p1199_p13, %p1198_p12 }
  0x20   :  { %p1201_p1 = pnand %p1200_p0, %p1194_p11 }
  0x22   :  { %1204 = shalt.err (!%p1201_p1)
}
  0x23   :  { %39 = dma.hbm_to_vmem [thread:$0]  %s1795_s2, 128, %s37_s27, [#allocation3]  }
  0x24   :  { %1227 = dma.done.wait [#allocation5], 16  }
  0x25   :  { %1228 = vsyncadd [#allocation5], 4294967280 }
  0x26   :  { %1229 = dma.done.wait [#allocation6], 16  }
  0x27   :  { %1230 = vsyncadd [#allocation6], 4294967280 }
  0x28   :  { %1231 = dma.done.wait [#allocation3], 128  }
  0x29   :  { %1232 = vsyncadd [#allocation3], 4294967168 }
  0x2a   :  { %49 = sfence }
  0x2b   :  { %v50_v0 = vld [vmem:[#allocation8] sm:$0xff]  ;;  %s1238_s10 = smov 10   ;;  %s1046_s11 = sld [smem:[#allocation2 + $0x1]]  ;;  %vm55_vm0 = vcmask 80896   ;;  %vm72_vm1 = vcmask 1031168   ;;  %vm88_vm2 = vcmask 1014784  }
  0x2c   :  { %52 = vrot.lane.b32.xlu0 %v50_v0, %s1238_s10  ;;  %s1047_s12 = sld [smem:[#allocation2 + $0x2]]  ;;  %s1048_s13 = sld [smem:[#allocation2 + $0x3]]  ;;  %vm104_vm3 = vcmask 998400   ;;  %vm120_vm4 = vcmask 982016   ;;  %vm136_vm5 = vcmask 965632   ;;  %vm152_vm6 = vcmask 949248  }
  0x2d   :  { %s1049_s2 = sld [smem:[#allocation2 + $0x4]]  ;;  %s1239_s14 = smov 126   ;;  %vm180_vm7 = vcmask 31744   ;;  %vm178_vm8 = vcmask 1047584   ;;  %vm205_vm11 = vcmask 1039360   ;;  %vm236_vm12 = vcmask 1022976  }
  0x2e   :  { %s1050_s15 = sld [smem:[#allocation2 + $0x5]]  ;;  %s1240_s16 = smov 124   ;;  %vm267_vm13 = vcmask 1006592   ;;  %vm298_vm14 = vcmask 990208   ;;  %vm329_vm15 = vcmask 973824  }
  0x2f   :  { %s1051_s17 = sld [smem:[#allocation2 + $0x6]]  ;;  %s1241_s18 = smov 122  }
  0x30   :  { %s1055_s19 = sld [smem:[#allocation2 + $0xc]]  ;;  %s1242_s20 = smov 120  }
  0x31   :  { %v63_v1 = vstv %s1046_s11  ;;  %s1056_s21 = sld [smem:[#allocation2 + $0xd]]  ;;  %s1243_s22 = smov 118  }
  0x32   :  { %v79_v7 = vstv %s1047_s12  ;;  %v95_v10 = vstv %s1048_s13  ;;  %s1057_s23 = sld [smem:[#allocation2 + $0xe]]  ;;  %s1244_s24 = smov 116  }
  0x33   :  { %v111_v13 = vstv %s1049_s2  ;;  %s1058_s1 = sld [smem:[#allocation2 + $0xf]]  ;;  %s1245_s25 = smov 127  }
  0x34   :  { %v127_v16 = vstv %s1050_s15  ;;  %s1059_s26 = sld [smem:[#allocation2 + $0x10]]  ;;  %s1060_s27 = sld [smem:[#allocation2 + $0x11]] }
  0x35   :  { %v143_v19 = vstv %s1051_s17  ;;  %s1246_s28 = smov 125   ;;  %s1061_s29 = sld [smem:[#allocation2 + $0x12]] }
  0x36   :  { %v196_v22 = vstv %s1055_s19  ;;  %s1062_s30 = sld [smem:[#allocation2 + $0x13]]  ;;  %s1247_s4 = smov 123  }
  0x37   :  { %v212_v25 = vstv %s1056_s21  ;;  %s1063_s5 = sld [smem:[#allocation2 + $0x14]]  ;;  %s1064_s0 = sld [smem:[#allocation2 + $0x15]] }
  0x38   :  { %v227_v28 = vstv %s1057_s23  ;;  %s1248_s6 = smov 121   ;;  %s1069_s7 = sld [smem:[#allocation2 + $0x17]] }
  0x39   :  { %v243_v31 = vstv %s1058_s1  ;;  %s1070_s8 = sld [smem:[#allocation2 + $0x18]]  ;;  %s1249_s9 = smov 119  }
  0x3a   :  { %v258_v34 = vstv %s1059_s26  ;;  %v274_v37 = vstv %s1060_s27  ;;  %s1071_s10 = sld [smem:[#allocation2 + $0x19]]  ;;  %s1072_s11 = sld [smem:[#allocation2 + $0x1a]] }
  0x3b   :  { %v289_v40 = vstv %s1061_s29  ;;  %s1073_s12 = sld [smem:[#allocation2 + $0x1b]]  ;;  %s1074_s13 = sld [smem:[#allocation2 + $0x1c]] }
  0x3c   :  { %v305_v43 = vstv %s1062_s30  ;;  %s1075_s2 = sld [smem:[#allocation2 + $0x1d]]  ;;  %s1076_s15 = sld [smem:[#allocation2 + $0x1e]] }
  0x3d   :  { %v320_v46 = vstv %s1063_s5  ;;  %v336_v49 = vstv %s1064_s0  ;;  %s1077_s17 = sld [smem:[#allocation2 + $0x1f]]  ;;  %s1078_s19 = sld [smem:[#allocation2 + $0x20]] }
  0x3e   :  { %v387_v52 = vstv %s1069_s7  ;;  %s1250_s21 = smov 114   ;;  %s1082_s23 = sld [smem:[#allocation2 + $0x22]] }
  0x3f   :  { %v400_v55 = vstv %s1070_s8  ;;  %s1251_s1 = smov 112   ;;  %s1083_s26 = sld [smem:[#allocation2 + $0x23]] }
  0x40   :  { %v413_v58 = vstv %s1071_s10  ;;  %v426_v61 = vstv %s1072_s11  ;;  %s1252_s27 = smov 110   ;;  %s1084_s29 = sld [smem:[#allocation2 + $0x24]] }
  0x41   :  { %v439_v0 = vstv %s1073_s12  ;;  %s1253_s30 = smov 108   ;;  %s1085_s5 = sld [smem:[#allocation2 + $0x25]] }
  0x42   :  { %s1096_s0 = sld [smem:[#allocation2 + $0x2d]]  ;;  %s1086_s7 = sld [smem:[#allocation2 + $0x26]] }
  0x43   :  { %s1425_s8 = sld [smem:[#allocation2 + $0x2e]]  ;;  %s1435_s10 = sld [smem:[#allocation7]] }
  0x44   :  { %s1442_s11 = sld [smem:[#allocation2 + $0x2f]]  ;;  %s1448_s12 = sld [smem:[#allocation2 + $0x28]] }
  0x9e   :  { %v53_v2 = vpop.permute.xlu0 %52 }
  0x9f   :  { %v1303_v3 = vsel %vm55_vm0, 0.0, %v53_v2  ;;  %v1305_v4 = vsel %vm55_vm0, %v53_v2, 0.0  ;;  %vm372_vm0 = vcmask 39936  }
  0xa0   :  { %v65_v5 = vmul.f32 %v63_v1, %v1305_v4  ;;  %v64_v6 = vmul.f32 %v63_v1, %v1303_v3  ;;  %v80_v8 = vmul.f32 %v79_v7, %v1303_v3  ;;  %v81_v9 = vmul.f32 %v79_v7, %v1305_v4 }
  0xa1   :  { %v96_v11 = vmul.f32 %v95_v10, %v1303_v3  ;;  %v97_v12 = vmul.f32 %v95_v10, %v1305_v4  ;;  %v112_v14 = vmul.f32 %v111_v13, %v1303_v3  ;;  %v113_v15 = vmul.f32 %v111_v13, %v1305_v4 }
  0xa2   :  { %70 = vrot.lane.b32.xlu1 %v65_v5, %s1239_s14  ;;  %68 = vrot.lane.b32.xlu0 %v64_v6, %s1239_s14  ;;  %v128_v17 = vmul.f32 %v127_v16, %v1303_v3  ;;  %v129_v18 = vmul.f32 %v127_v16, %v1305_v4  ;;  %v144_v20 = vmul.f32 %v143_v19, %v1303_v3  ;;  %v452_v5 = vstv %s1074_s13  ;;  %s159_s13 = ssub.f32 0.0, %s1435_s10 }
  0xa3   :  { %v145_v21 = vmul.f32 %v143_v19, %v1305_v4  ;;  %v198_v23 = vmul.f32 %v196_v22, %v1305_v4  ;;  %v197_v24 = vmul.f32 %v196_v22, %v1303_v3  ;;  %v214_v26 = vmul.f32 %v212_v25, %v1305_v4 }
  0xa4   :  { %v213_v27 = vmul.f32 %v212_v25, %v1303_v3  ;;  %v229_v29 = vmul.f32 %v227_v28, %v1305_v4  ;;  %v228_v30 = vmul.f32 %v227_v28, %v1303_v3  ;;  %v245_v32 = vmul.f32 %v243_v31, %v1305_v4 }
  0xa5   :  { %v244_v33 = vmul.f32 %v243_v31, %v1303_v3  ;;  %v260_v35 = vmul.f32 %v258_v34, %v1305_v4  ;;  %v259_v36 = vmul.f32 %v258_v34, %v1303_v3  ;;  %v276_v38 = vmul.f32 %v274_v37, %v1305_v4 }
  0xa6   :  { %84 = vrot.lane.b32.xlu1 %v80_v8, %s1240_s16  ;;  %86 = vrot.lane.b32.xlu0 %v81_v9, %s1240_s16  ;;  %v275_v39 = vmul.f32 %v274_v37, %v1303_v3  ;;  %v291_v41 = vmul.f32 %v289_v40, %v1305_v4  ;;  %v290_v42 = vmul.f32 %v289_v40, %v1303_v3  ;;  %v465_v8 = vstv %s1075_s2  ;;  %s1462_s2 = sld [smem:[#allocation2 + $0x30]] }
  0xa7   :  { %v307_v44 = vmul.f32 %v305_v43, %v1305_v4  ;;  %v306_v45 = vmul.f32 %v305_v43, %v1303_v3  ;;  %v322_v47 = vmul.f32 %v320_v46, %v1305_v4  ;;  %v321_v48 = vmul.f32 %v320_v46, %v1303_v3 }
  0xa8   :  { %v338_v50 = vmul.f32 %v336_v49, %v1305_v4  ;;  %v337_v51 = vmul.f32 %v336_v49, %v1303_v3  ;;  %v389_v53 = vmul.f32 %v387_v52, %v1305_v4  ;;  %v388_v54 = vmul.f32 %v387_v52, %v1303_v3 }
  0xa9   :  { %v401_v56 = vmul.f32 %v400_v55, %v1303_v3  ;;  %v402_v57 = vmul.f32 %v400_v55, %v1305_v4  ;;  %v414_v59 = vmul.f32 %v413_v58, %v1303_v3  ;;  %v415_v60 = vmul.f32 %v413_v58, %v1305_v4 }
  0xaa   :  { %100 = vrot.lane.b32.xlu1 %v96_v11, %s1241_s18  ;;  %102 = vrot.lane.b32.xlu0 %v97_v12, %s1241_s18  ;;  %v427_v62 = vmul.f32 %v426_v61, %v1303_v3  ;;  %v428_v63 = vmul.f32 %v426_v61, %v1305_v4  ;;  %v440_v1 = vmul.f32 %v439_v0, %v1303_v3  ;;  %v479_v11 = vstv %s1076_s15  ;;  %s1470_s15 = sld [smem:[#allocation2 + $0x29]] }
  0xab   :  { %v441_v2 = vmul.f32 %v439_v0, %v1305_v4  ;;  %v453_v6 = vmul.f32 %v452_v5, %v1303_v3  ;;  %v454_v7 = vmul.f32 %v452_v5, %v1305_v4  ;;  %v466_v9 = vmul.f32 %v465_v8, %v1303_v3 }
  0xac   :  { %v467_v10 = vmul.f32 %v465_v8, %v1305_v4  ;;  %v480_v12 = vmul.f32 %v479_v11, %v1303_v3  ;;  %v481_v13 = vmul.f32 %v479_v11, %v1305_v4  ;;  %v727_v34 = vstv %s1096_s0  ;;  %s1534_s0 = sld [smem:[#allocation2 + $0x38]] }
  0xad   :  { %v728_v37 = vmul.f32 %v727_v34, %v1303_v3  ;;  %v632_v11 = vstv %s1448_s12  ;;  %s1113_s12 = sld [smem:[#allocation2 + $0x3d]] }
  0xae   :  { %116 = vrot.lane.b32.xlu1 %v112_v14, %s1242_s20  ;;  %118 = vrot.lane.b32.xlu0 %v113_v15, %s1242_s20  ;;  %v493_v14 = vstv %s1077_s17  ;;  %s1100_s17 = sld [smem:[#allocation2 + $0x31]] }
  0xaf   :  { %v494_v15 = vmul.f32 %v493_v14, %v1303_v3  ;;  %v495_v16 = vmul.f32 %v493_v14, %v1305_v4 }
  0xb2   :  { %132 = vrot.lane.b32.xlu1 %v128_v17, %s1243_s22  ;;  %134 = vrot.lane.b32.xlu0 %v129_v18, %s1243_s22  ;;  %v507_v17 = vstv %s1078_s19  ;;  %s1090_s19 = sld [smem:[#allocation2 + $0x2a]] }
  0xb3   :  { %v508_v18 = vmul.f32 %v507_v17, %v1303_v3  ;;  %v509_v19 = vmul.f32 %v507_v17, %v1305_v4 }
  0xb6   :  { %148 = vrot.lane.b32.xlu1 %v144_v20, %s1244_s24  ;;  %150 = vrot.lane.b32.xlu0 %v145_v21, %s1244_s24  ;;  %v542_v20 = vstv %s1082_s23  ;;  %s1054_s23 = sld [smem:[#allocation2 + $0xb]] }
  0xb7   :  { %v543_v21 = vmul.f32 %v542_v20, %v1303_v3  ;;  %v544_v22 = vmul.f32 %v542_v20, %v1305_v4  ;;  %v633_v20 = vmul.f32 %v632_v11, %v1303_v3 }
  0xba   :  { %203 = vrot.lane.b32.xlu1 %v198_v23, %s1245_s25  ;;  %201 = vrot.lane.b32.xlu0 %v197_v24, %s1245_s25  ;;  %v557_v23 = vstv %s1083_s26  ;;  %s1506_s26 = sld [smem:[#allocation2 + $0x2b]] }
  0xbb   :  { %v558_v24 = vmul.f32 %v557_v23, %v1303_v3  ;;  %v559_v25 = vmul.f32 %v557_v23, %v1305_v4 }
  0xbe   :  { %219 = vrot.lane.b32.xlu1 %v214_v26, %s1239_s14  ;;  %217 = vrot.lane.b32.xlu0 %v213_v27, %s1239_s14  ;;  %v572_v26 = vstv %s1084_s29  ;;  %s1515_s29 = sld [smem:[#allocation2 + $0x33]] }
  0xbf   :  { %v573_v27 = vmul.f32 %v572_v26, %v1303_v3  ;;  %v574_v28 = vmul.f32 %v572_v26, %v1305_v4 }
  0xc2   :  { %234 = vrot.lane.b32.xlu1 %v229_v29, %s1246_s28  ;;  %232 = vrot.lane.b32.xlu0 %v228_v30, %s1246_s28  ;;  %v587_v29 = vstv %s1085_s5  ;;  %s1525_s5 = sld [smem:[#allocation2 + $0x34]] }
  0xc6   :  { %250 = vrot.lane.b32.xlu1 %v245_v32, %s1240_s16  ;;  %248 = vrot.lane.b32.xlu0 %v244_v33, %s1240_s16  ;;  %v588_v32 = vmul.f32 %v587_v29, %v1303_v3  ;;  %v589_v33 = vmul.f32 %v587_v29, %v1305_v4 }
  0xca   :  { %265 = vrot.lane.b32.xlu1 %v260_v35, %s1247_s4  ;;  %263 = vrot.lane.b32.xlu0 %v259_v36, %s1247_s4 }
  0xce   :  { %281 = vrot.lane.b32.xlu1 %v276_v38, %s1241_s18  ;;  %279 = vrot.lane.b32.xlu0 %v275_v39, %s1241_s18  ;;  %v729_v38 = vmul.f32 %v727_v34, %v1305_v4  ;;  %v602_v39 = vstv %s1086_s7  ;;  %s1541_s7 = sld [smem:[#allocation2 + $0x16]] }
  0xcf   :  { %v603_v43 = vmul.f32 %v602_v39, %v1303_v3 }
  0xd2   :  { %296 = vrot.lane.b32.xlu1 %v291_v41, %s1248_s6  ;;  %294 = vrot.lane.b32.xlu0 %v290_v42, %s1248_s6 }
  0xd6   :  { %312 = vrot.lane.b32.xlu1 %v307_v44, %s1242_s20  ;;  %310 = vrot.lane.b32.xlu0 %v306_v45, %s1242_s20  ;;  %v604_v44 = vmul.f32 %v602_v39, %v1305_v4 }
  0xda   :  { %327 = vrot.lane.b32.xlu1 %v322_v47, %s1249_s9  ;;  %325 = vrot.lane.b32.xlu0 %v321_v48, %s1249_s9  ;;  %v742_v47 = vstv %s1425_s8 }
  0xdb   :  { %v744_v55 = vmul.f32 %v742_v47, %v1305_v4 }
  0xde   :  { %343 = vrot.lane.b32.xlu1 %v338_v50, %s1243_s22  ;;  %341 = vrot.lane.b32.xlu0 %v337_v51, %s1243_s22 }
  0xe2   :  { %394 = vrot.lane.b32.xlu1 %v389_v53, %s1239_s14  ;;  %392 = vrot.lane.b32.xlu0 %v388_v54, %s1239_s14  ;;  %v743_v54 = vmul.f32 %v742_v47, %v1303_v3  ;;  %v192_v47 = vstv %s1054_s23 }
  0xe6   :  { %405 = vrot.lane.b32.xlu1 %v401_v56, %s1240_s16  ;;  %407 = vrot.lane.b32.xlu0 %v402_v57, %s1240_s16 }
  0xea   :  { %418 = vrot.lane.b32.xlu1 %v414_v59, %s1241_s18  ;;  %420 = vrot.lane.b32.xlu0 %v415_v60, %s1241_s18 }
  0xee   :  { %431 = vrot.lane.b32.xlu1 %v427_v62, %s1242_s20  ;;  %433 = vrot.lane.b32.xlu0 %v428_v63, %s1242_s20 }
  0xf2   :  { %444 = vrot.lane.b32.xlu1 %v440_v1, %s1243_s22  ;;  %446 = vrot.lane.b32.xlu0 %v441_v2, %s1243_s22 }
  0xf6   :  { %457 = vrot.lane.b32.xlu1 %v453_v6, %s1244_s24  ;;  %459 = vrot.lane.b32.xlu0 %v454_v7, %s1244_s24  ;;  %v757_v7 = vstv %s1442_s11  ;;  %s1112_s11 = sld [smem:[#allocation2 + $0x3c]] }
  0xfa   :  { %470 = vrot.lane.b32.xlu1 %v466_v9, %s1250_s21  ;;  %472 = vrot.lane.b32.xlu0 %v467_v10, %s1250_s21  ;;  %v160_v10 = vstv %s159_s13  ;;  %s1114_s13 = sld [smem:[#allocation2 + $0x3e]] }
  0xfe   :  { %484 = vrot.lane.b32.xlu1 %v480_v12, %s1251_s1  ;;  %486 = vrot.lane.b32.xlu0 %v481_v13, %s1251_s1 }
 0x102   :  { %498 = vrot.lane.b32.xlu1 %v494_v15, %s1252_s27  ;;  %500 = vrot.lane.b32.xlu0 %v495_v16, %s1252_s27  ;;  %v758_v15 = vmul.f32 %v757_v7, %v1303_v3  ;;  %v759_v16 = vmul.f32 %v757_v7, %v1305_v4 }
 0x106   :  { %512 = vrot.lane.b32.xlu1 %v508_v18, %s1253_s30  ;;  %514 = vrot.lane.b32.xlu0 %v509_v19, %s1253_s30 }
 0x10a   :  { %547 = vrot.lane.b32.xlu1 %v543_v21, %s1245_s25  ;;  %549 = vrot.lane.b32.xlu0 %v544_v22, %s1245_s25  ;;  %s58_s25 = sld [smem:[#allocation2]] }
 0x10e   :  { %562 = vrot.lane.b32.xlu1 %v558_v24, %s1239_s14  ;;  %564 = vrot.lane.b32.xlu0 %v559_v25, %s1239_s14  ;;  %v634_v24 = vmul.f32 %v632_v11, %v1305_v4  ;;  %v1254_v25 = vmov 0.0  }
 0x110   :  { %v59_v40 = vstv %s58_s25  ;;  %s1543_s25 = sld [smem:[#allocation2 + $0x39]] }
 0x111   :  { %v61_v45 = vmul.f32 %v59_v40, %v1305_v4  ;;  %v60_v48 = vmul.f32 %v59_v40, %v1303_v3 }
 0x112   :  { %577 = vrot.lane.b32.xlu1 %v573_v27, %s1246_s28  ;;  %579 = vrot.lane.b32.xlu0 %v574_v28, %s1246_s28  ;;  %s1431_s28 = sld [smem:[#allocation2 + $0x27]]  ;;  %v772_v28 = vstv %s1462_s2  ;;  %s1116_s2 = sld [smem:[#allocation2 + $0x40]] }
 0x113   :  { %v773_v34 = vmul.f32 %v772_v28, %v1303_v3 }
 0x114   :  { %v71_v30 = vpop.permute.xlu1 %70  ;;  %v69_v31 = vpop.permute.xlu0 %68 }
 0x115   :  { %v73_v46 = vsel %vm72_vm1, %v69_v31, %v71_v30  ;;  %v77_v49 = vadd.f32 %v71_v30, %v61_v45 }
 0x116   :  { %592 = vrot.lane.b32.xlu1 %v588_v32, %s1240_s16  ;;  %594 = vrot.lane.b32.xlu0 %v589_v33, %s1240_s16  ;;  %v76_v51 = vadd.f32 %v73_v46, %v60_v48  ;;  %v662_v46 = vstv %s1090_s19 }
 0x118   :  { %v85_v35 = vpop.permute.xlu1 %84  ;;  %v87_v36 = vpop.permute.xlu0 %86  ;;  %v617_v58 = vstv %s1431_s28  ;;  %s1557_s28 = sld [smem:[#allocation2 + $0x3a]] }
 0x119   :  { %v89_v50 = vsel %vm88_vm2, %v85_v35, %v87_v36  ;;  %v93_v56 = vadd.f32 %v87_v36, %v77_v49  ;;  %v618_v1 = vmul.f32 %v617_v58, %v1303_v3  ;;  %v619_v2 = vmul.f32 %v617_v58, %v1305_v4 }
 0x11a   :  { %732 = vrot.lane.b32.xlu1 %v728_v37, %s1239_s14  ;;  %734 = vrot.lane.b32.xlu0 %v729_v38, %s1239_s14  ;;  %v92_v59 = vadd.f32 %v89_v50, %v76_v51  ;;  %v774_v35 = vmul.f32 %v772_v28, %v1305_v4  ;;  %v647_v36 = vstv %s1470_s15  ;;  %v663_v50 = vmul.f32 %v662_v46, %v1303_v3  ;;  %s1725_s15 = sld [smem:[#allocation2 + $0x37]] }
 0x11b   :  { %v648_v39 = vmul.f32 %v647_v36, %v1303_v3  ;;  %v649_v40 = vmul.f32 %v647_v36, %v1305_v4  ;;  %v664_v51 = vmul.f32 %v662_v46, %v1305_v4 }
 0x11c   :  { %v101_v41 = vpop.permute.xlu1 %100  ;;  %v103_v42 = vpop.permute.xlu0 %102 }
 0x11d   :  { %v105_v57 = vsel %vm104_vm3, %v101_v41, %v103_v42  ;;  %v109_v60 = vadd.f32 %v103_v42, %v93_v56  ;;  %v787_v41 = vstv %s1100_s17 }
 0x11e   :  { %607 = vrot.lane.b32.xlu1 %v603_v43, %s1247_s4  ;;  %609 = vrot.lane.b32.xlu0 %v604_v44, %s1247_s4  ;;  %v108_v62 = vadd.f32 %v105_v57, %v92_v59  ;;  %v788_v44 = vmul.f32 %v787_v41, %v1303_v3  ;;  %v789_v45 = vmul.f32 %v787_v41, %v1305_v4  ;;  %v883_v41 = vstv %s1534_s0 }
 0x11f   :  { %v884_v46 = vmul.f32 %v883_v41, %v1303_v3 }
 0x120   :  { %v117_v52 = vpop.permute.xlu1 %116  ;;  %v119_v53 = vpop.permute.xlu0 %118 }
 0x121   :  { %v121_v61 = vsel %vm120_vm4, %v117_v52, %v119_v53  ;;  %v125_v5 = vadd.f32 %v119_v53, %v109_v60  ;;  %v194_v52 = vmul.f32 %v192_v47, %v1305_v4 }
 0x122   :  { %747 = vrot.lane.b32.xlu1 %v743_v54, %s1240_s16  ;;  %749 = vrot.lane.b32.xlu0 %v744_v55, %s1240_s16  ;;  %v124_v8 = vadd.f32 %v121_v61, %v108_v62  ;;  %v193_v55 = vmul.f32 %v192_v47, %v1303_v3  ;;  %v384_v47 = vstv %s1541_s7 }
 0x124   :  { %v133_v63 = vpop.permute.xlu1 %132  ;;  %v135_v0 = vpop.permute.xlu0 %134 }
 0x125   :  { %v137_v6 = vsel %vm136_vm5, %v133_v63, %v135_v0  ;;  %v141_v9 = vadd.f32 %v135_v0, %v125_v5 }
 0x126   :  { %622 = vrot.lane.b32.xlu1 %v618_v1, %s1241_s18  ;;  %624 = vrot.lane.b32.xlu0 %v619_v2, %s1241_s18  ;;  %v140_v12 = vadd.f32 %v137_v6, %v124_v8  ;;  %v677_v1 = vstv %s1506_s26 }
 0x127   :  { %v679_v11 = vmul.f32 %v677_v1, %v1305_v4 }
 0x128   :  { %v149_v13 = vpop.permute.xlu1 %148  ;;  %v151_v14 = vpop.permute.xlu0 %150 }
 0x129   :  { %v153_v17 = vsel %vm152_vm6, %v149_v13, %v151_v14  ;;  %v157_v18 = vadd.f32 %v151_v14, %v141_v9  ;;  %v817_v14 = vstv %s1515_s29 }
 0x12a   :  { %v156_v19 = vadd.f32 %v153_v17, %v140_v12  ;;  %762 = vrot.lane.b32.xlu1 %v758_v15, %s1241_s18  ;;  %764 = vrot.lane.b32.xlu0 %v759_v16, %s1241_s18 }
 0x12b   :  { %vm162_vm9 = vcmp.gt.f32.partialorder %v157_v18, %v160_v10  ;;  %v1475_v21 = vsel %vm180_vm7, %v157_v18, -inf  ;;  %vm1797_vm7 = vcmask 1047592  }
 0x12c   :  { %v204_v22 = vpop.permute.xlu1 %203  ;;  %v202_v23 = vpop.permute.xlu0 %201  ;;  %vm161_vm10 = vcmp.gt.f32.partialorder %v156_v19, %v160_v10  ;;  %v1479_v26 = vsel %vm162_vm9, 1.0, %v1254_v25  ;;  %v1481_v27 = vsel %vm178_vm8, %v156_v19, -inf  ;;  %v678_v10 = vmul.f32 %v677_v1, %v1303_v3 }
 0x12d   :  { %v1485_v29 = vsel %vm161_vm10, 1.0, %v1254_v25  ;;  %v182_v30 = vmax.f32 %v1481_v27, %v1475_v21  ;;  %v206_v53 = vsel %vm205_vm11, %v202_v23, %v204_v22  ;;  %v210_v56 = vadd.f32 %v204_v22, %v194_v52 }
 0x12e   :  { %637 = vrot.lane.b32.xlu1 %v633_v20, %s1248_s6  ;;  %639 = vrot.lane.b32.xlu0 %v634_v24, %s1248_s6  ;;  %v1141_v31 = vpack.i.bf16 %v1479_v26, %v1485_v29  ;;  %s1500_s6 = sld [smem:[#allocation2 + $0x32]]  ;;  %v209_v58 = vadd.f32 %v206_v53, %v193_v55  ;;  %v818_v22 = vmul.f32 %v817_v14, %v1303_v3  ;;  %vm474_vm10 = vcmask 932864  }
 0x12f   :  { %v819_v23 = vmul.f32 %v817_v14, %v1305_v4  ;;  %v885_v53 = vmul.f32 %v883_v41, %v1305_v4 }
 0x130   :  { %v220_v32 = vpop.permute.xlu1 %219  ;;  %v218_v33 = vpop.permute.xlu0 %217 }
 0x131   :  { %v221_v57 = vsel %vm72_vm1, %v218_v33, %v220_v32  ;;  %v225_v63 = vadd.f32 %v220_v32, %v210_v56  ;;  %v832_v32 = vstv %s1525_s5 }
 0x132   :  { %777 = vrot.lane.b32.xlu1 %v773_v34, %s1242_s20  ;;  %779 = vrot.lane.b32.xlu0 %v774_v35, %s1242_s20  ;;  %v224_v2 = vadd.f32 %v221_v57, %v209_v58  ;;  %v385_v57 = vmul.f32 %v384_v47, %v1303_v3 }
 0x134   :  { %v235_v37 = vpop.permute.xlu1 %234  ;;  %v233_v38 = vpop.permute.xlu0 %232  ;;  %v802_v54 = vstv %s1500_s6 }
 0x135   :  { %v803_v61 = vmul.f32 %v802_v54, %v1303_v3  ;;  %v804_v62 = vmul.f32 %v802_v54, %v1305_v4  ;;  %v237_v0 = vsel %vm236_vm12, %v233_v38, %v235_v37  ;;  %v241_v5 = vadd.f32 %v235_v37, %v225_v63 }
 0x136   :  { %652 = vrot.lane.b32.xlu1 %v648_v39, %s1242_s20  ;;  %654 = vrot.lane.b32.xlu0 %v649_v40, %s1242_s20  ;;  %v240_v7 = vadd.f32 %v237_v0, %v224_v2  ;;  %v833_v39 = vmul.f32 %v832_v32, %v1303_v3  ;;  %v834_v40 = vmul.f32 %v832_v32, %v1305_v4  ;;  %v909_v2 = vstv %s1557_s28 }
 0x138   :  { %v251_v42 = vpop.permute.xlu1 %250  ;;  %v249_v43 = vpop.permute.xlu0 %248 }
 0x139   :  { %v252_v6 = vsel %vm88_vm2, %v249_v43, %v251_v42  ;;  %v256_v12 = vadd.f32 %v251_v42, %v241_v5 }
 0x13a   :  { %792 = vrot.lane.b32.xlu1 %v788_v44, %s1243_s22  ;;  %794 = vrot.lane.b32.xlu0 %v789_v45, %s1243_s22  ;;  %v255_v15 = vadd.f32 %v252_v6, %v240_v7 }
 0x13c   :  { %v266_v48 = vpop.permute.xlu1 %265  ;;  %v264_v49 = vpop.permute.xlu0 %263 }
 0x13d   :  { %v268_v13 = vsel %vm267_vm13, %v264_v49, %v266_v48  ;;  %v272_v16 = vadd.f32 %v266_v48, %v256_v12  ;;  %v896_v48 = vstv %s1543_s25 }
 0x13e   :  { %667 = vrot.lane.b32.xlu1 %v663_v50, %s1249_s9  ;;  %669 = vrot.lane.b32.xlu0 %v664_v51, %s1249_s9  ;;  %s1532_s9 = sld [smem:[#allocation7 + $0x1]]  ;;  %v271_v18 = vadd.f32 %v268_v13, %v255_v15  ;;  %v897_v58 = vmul.f32 %v896_v48, %v1303_v3  ;;  %v898_v63 = vmul.f32 %v896_v48, %v1305_v4 }
 0x140   :  { %v282_v59 = vpop.permute.xlu1 %281  ;;  %v280_v60 = vpop.permute.xlu0 %279 }
 0x141   :  { %v283_v17 = vsel %vm104_vm3, %v280_v60, %v282_v59  ;;  %v287_v24 = vadd.f32 %v282_v59, %v272_v16 }
 0x142   :  { %807 = vrot.lane.b32.xlu1 %v803_v61, %s1244_s24  ;;  %809 = vrot.lane.b32.xlu0 %v804_v62, %s1244_s24  ;;  %v286_v33 = vadd.f32 %v283_v17, %v271_v18 }
 0x144   :  { %v297_v8 = vpop.permute.xlu1 %296  ;;  %v295_v9 = vpop.permute.xlu0 %294  ;;  %s351_s8 = ssub.f32 0.0, %s1532_s9 }
 0x145   :  { %v299_v28 = vsel %vm298_vm14, %v295_v9, %v297_v8  ;;  %v303_v34 = vadd.f32 %v297_v8, %v287_v24 }
 0x146   :  { %682 = vrot.lane.b32.xlu1 %v678_v10, %s1243_s22  ;;  %684 = vrot.lane.b32.xlu0 %v679_v11, %s1243_s22  ;;  %v302_v36 = vadd.f32 %v299_v28, %v286_v33  ;;  %v352_v50 = vstv %s351_s8  ;;  %v910_v11 = vmul.f32 %v909_v2, %v1303_v3 }
 0x148   :  { %v313_v19 = vpop.permute.xlu1 %312  ;;  %v311_v20 = vpop.permute.xlu0 %310 }
 0x149   :  { %v314_v35 = vsel %vm120_vm4, %v311_v20, %v313_v19  ;;  %v318_v42 = vadd.f32 %v313_v19, %v303_v34 }
 0x14a   :  { %822 = vrot.lane.b32.xlu1 %v818_v22, %s1250_s21  ;;  %824 = vrot.lane.b32.xlu0 %v819_v23, %s1250_s21  ;;  %v317_v44 = vadd.f32 %v314_v35, %v302_v36 }
 0x14c   :  { %v328_v37 = vpop.permute.xlu1 %327  ;;  %v326_v38 = vpop.permute.xlu0 %325 }
 0x14d   :  { %v330_v43 = vsel %vm329_vm15, %v326_v38, %v328_v37  ;;  %v334_v45 = vadd.f32 %v328_v37, %v318_v42 }
 0x14e   :  { %837 = vrot.lane.b32.xlu1 %v833_v39, %s1251_s1  ;;  %839 = vrot.lane.b32.xlu0 %v834_v40, %s1251_s1  ;;  %v333_v49 = vadd.f32 %v330_v43, %v317_v44 }
 0x150   :  { %v344_v51 = vpop.permute.xlu1 %343  ;;  %v342_v52 = vpop.permute.xlu0 %341 }
 0x151   :  { %v349_v54 = vadd.f32 %v344_v51, %v334_v45  ;;  %v345_v55 = vsel %vm136_vm5, %v342_v52, %v344_v51 }
 0x152   :  { %v348_v56 = vadd.f32 %v345_v55, %v333_v49  ;;  %888 = vrot.lane.b32.xlu1 %v884_v46, %s1239_s14  ;;  %890 = vrot.lane.b32.xlu0 %v885_v53, %s1239_s14 }
 0x153   :  { %vm354_vm8 = vcmp.gt.f32.partialorder %v349_v54, %v352_v50  ;;  %v373_v59 = vsel %vm372_vm0, %v349_v54, -inf }
 0x154   :  { %v1067_v60 = vsel %vm354_vm8, 1.0, %v1254_v25  ;;  %vm353_vm9 = vcmp.gt.f32.partialorder %v348_v56, %v352_v50  ;;  %v395_v61 = vpop.permute.xlu1 %394  ;;  %v393_v62 = vpop.permute.xlu0 %392  ;;  %v371_v0 = vsel %vm1797_vm7, %v348_v56, -inf  ;;  %vm488_vm8 = vcmask 916480  }
 0x155   :  { %v396_v1 = vsel %vm72_vm1, %v393_v62, %v395_v61  ;;  %v1066_v5 = vsel %vm353_vm9, 1.0, %v1254_v25  ;;  %v374_v6 = vmax.f32 %v371_v0, %v373_v59  ;;  %vm502_vm9 = vcmask 900096  }
 0x156   :  { %v398_v7 = vadd.f32 %v396_v1, %v385_v57  ;;  %901 = vrot.lane.b32.xlu1 %v897_v58, %s1240_s16  ;;  %903 = vrot.lane.b32.xlu0 %v898_v63, %s1240_s16  ;;  %v1146_v8 = vpack.i.bf16 %v1067_v60, %v1066_v5  ;;  %vm516_vm7 = vcmask 883712   ;;  %v911_v60 = vmul.f32 %v909_v2, %v1305_v4 }
 0x157   :  { %v935_v63 = vstv %s1112_s11 }
 0x158   :  { %v406_v9 = vpop.permute.xlu1 %405  ;;  %v408_v10 = vpop.permute.xlu0 %407  ;;  %v937_v2 = vmul.f32 %v935_v63, %v1305_v4  ;;  %v936_v5 = vmul.f32 %v935_v63, %v1303_v3 }
 0x159   :  { %v409_v12 = vsel %vm88_vm2, %v406_v9, %v408_v10 }
 0x15a   :  { %v411_v13 = vadd.f32 %v409_v12, %v398_v7  ;;  %914 = vrot.lane.b32.xlu1 %v910_v11, %s1241_s18  ;;  %1147 = vrot.lane.b32.xlu0 %v1146_v8, %s1247_s4  ;;  %v961_v11 = vstv %s1114_s13 }
 0x15c   :  { %v419_v14 = vpop.permute.xlu1 %418  ;;  %v421_v15 = vpop.permute.xlu0 %420 }
 0x15d   :  { %v422_v16 = vsel %vm104_vm3, %v419_v14, %v421_v15  ;;  %v963_v14 = vmul.f32 %v961_v11, %v1305_v4  ;;  %v962_v15 = vmul.f32 %v961_v11, %v1303_v3 }
 0x15e   :  { %v424_v17 = vadd.f32 %v422_v16, %v411_v13  ;;  %1142 = vrot.lane.b32.xlu1 %v1141_v31, %s1240_s16  ;;  %s1111_s16 = sld [smem:[#allocation2 + $0x3b]] }
 0x160   :  { %v432_v18 = vpop.permute.xlu1 %431  ;;  %v434_v19 = vpop.permute.xlu0 %433 }
 0x161   :  { %v435_v20 = vsel %vm120_vm4, %v432_v18, %v434_v19 }
 0x162   :  { %v437_v22 = vadd.f32 %v435_v20, %v424_v17 }
 0x164   :  { %v445_v23 = vpop.permute.xlu1 %444  ;;  %v447_v24 = vpop.permute.xlu0 %446  ;;  %v922_v61 = vstv %s1111_s16 }
 0x165   :  { %v448_v28 = vsel %vm136_vm5, %v445_v23, %v447_v24  ;;  %v923_v62 = vmul.f32 %v922_v61, %v1303_v3  ;;  %v987_v23 = vstv %s1116_s2 }
 0x166   :  { %v450_v32 = vadd.f32 %v448_v28, %v437_v22 }
 0x168   :  { %v458_v33 = vpop.permute.xlu1 %457  ;;  %v460_v34 = vpop.permute.xlu0 %459 }
 0x169   :  { %v461_v35 = vsel %vm152_vm6, %v458_v33, %v460_v34  ;;  %v989_v34 = vmul.f32 %v987_v23, %v1305_v4 }
 0x16a   :  { %v463_v36 = vadd.f32 %v461_v35, %v450_v32  ;;  %v988_v35 = vmul.f32 %v987_v23, %v1303_v3 }
 0x16c   :  { %v471_v37 = vpop.permute.xlu1 %470  ;;  %v473_v38 = vpop.permute.xlu0 %472 }
 0x16d   :  { %v475_v26 = vsel %vm474_vm10, %v471_v37, %v473_v38 }
 0x16e   :  { %v477_v29 = vadd.f32 %v475_v26, %v463_v36 }
 0x170   :  { %v485_v31 = vpop.permute.xlu1 %484  ;;  %v487_v39 = vpop.permute.xlu0 %486 }
 0x171   :  { %v489_v40 = vsel %vm488_vm8, %v485_v31, %v487_v39 }
 0x172   :  { %v491_v41 = vadd.f32 %v489_v40, %v477_v29 }
 0x174   :  { %v499_v42 = vpop.permute.xlu1 %498  ;;  %v501_v43 = vpop.permute.xlu0 %500 }
 0x175   :  { %v503_v44 = vsel %vm502_vm9, %v499_v42, %v501_v43 }
 0x176   :  { %v505_v45 = vadd.f32 %v503_v44, %v491_v41 }
 0x178   :  { %v513_v46 = vpop.permute.xlu1 %512  ;;  %v515_v47 = vpop.permute.xlu0 %514 }
 0x179   :  { %v517_v48 = vsel %vm516_vm7, %v513_v46, %v515_v47  ;;  %375 = vmax.xlane.f32.xlu0 %v374_v6  ;;  %v948_v6 = vstv %s1113_s12 }
 0x17a   :  { %v1597_v49 = vadd.f32 %v517_v48, %v505_v45  ;;  %v950_v9 = vmul.f32 %v948_v6, %v1305_v4  ;;  %v949_v10 = vmul.f32 %v948_v6, %v1303_v3 }
 0x17c   :  { %v548_v50 = vpop.permute.xlu1 %547  ;;  %v1599_v51 = vpop.permute.xlu0 %549 }
 0x17d   :  { %v551_v33 = vsel %vm205_vm11, %v548_v50, %v1599_v51 }
 0x180   :  { %v1601_v52 = vpop.permute.xlu1 %562  ;;  %v1603_v53 = vpop.permute.xlu0 %564 }
 0x181   :  { %v566_v26 = vsel %vm72_vm1, %v1601_v52, %v1603_v53 }
 0x182   :  { %183 = vmax.xlane.f32.xlu1 %v182_v30  ;;  %v924_v30 = vmul.f32 %v922_v61, %v1305_v4 }
 0x184   :  { %v1608_v54 = vpop.permute.xlu1 %577  ;;  %v1610_v55 = vpop.permute.xlu0 %579 }
 0x185   :  { %v581_v41 = vsel %vm236_vm12, %v1608_v54, %v1610_v55 }
 0x188   :  { %v1612_v56 = vpop.permute.xlu1 %592  ;;  %v1614_v57 = vpop.permute.xlu0 %594 }
 0x189   :  { %v596_v45 = vsel %vm88_vm2, %v1612_v56, %v1614_v57 }
 0x18c   :  { %v1616_v58 = vpop.permute.xlu1 %732  ;;  %v1618_v59 = vpop.permute.xlu0 %734 }
 0x18f   :  { %916 = vrot.lane.b32.xlu0 %v911_v60, %s1241_s18  ;;  %s1115_s18 = sld [smem:[#allocation2 + $0x3f]] }
 0x190   :  { %v1624_v21 = vpop.permute.xlu1 %607  ;;  %v1626_v27 = vpop.permute.xlu0 %609 }
 0x193   :  { %929 = vrot.lane.b32.xlu0 %v924_v30, %s1242_s20  ;;  %927 = vrot.lane.b32.xlu1 %v923_v62, %s1242_s20  ;;  %s1081_s20 = sld [smem:[#allocation2 + $0x21]] }
 0x194   :  { %v1632_v0 = vpop.permute.xlu1 %747  ;;  %v1634_v1 = vpop.permute.xlu0 %749 }
 0x195   :  { %v974_v16 = vstv %s1115_s18 }
 0x196   :  { %v976_v19 = vmul.f32 %v974_v16, %v1305_v4  ;;  %v975_v20 = vmul.f32 %v974_v16, %v1303_v3 }
 0x197   :  { %942 = vrot.lane.b32.xlu0 %v937_v2, %s1243_s22  ;;  %940 = vrot.lane.b32.xlu1 %v936_v5, %s1243_s22  ;;  %s1652_s22 = sld [smem:[#allocation2 + $0x41]]  ;;  %v751_v5 = vsel %vm88_vm2, %v1632_v0, %v1634_v1 }
 0x198   :  { %v623_v7 = vpop.permute.xlu1 %622  ;;  %v1640_v8 = vpop.permute.xlu0 %624 }
 0x199   :  { %v538_v22 = vstv %s1081_s20 }
 0x19a   :  { %v540_v32 = vmul.f32 %v538_v22, %v1305_v4  ;;  %v539_v36 = vmul.f32 %v538_v22, %v1303_v3 }
 0x19b   :  { %955 = vrot.lane.b32.xlu0 %v950_v9, %s1244_s24  ;;  %953 = vrot.lane.b32.xlu1 %v949_v10, %s1244_s24  ;;  %s1668_s24 = sld [smem:[#allocation2 + $0x2c]] }
 0x19c   :  { %v1646_v12 = vpop.permute.xlu1 %762  ;;  %v1648_v13 = vpop.permute.xlu0 %764  ;;  %v555_v38 = vadd.f32 %v1599_v51, %v540_v32  ;;  %v554_v29 = vadd.f32 %v551_v33, %v539_v36  ;;  %v611_v51 = vsel %vm267_vm13, %v1624_v21, %v1626_v27 }
 0x19d   :  { %v1000_v37 = vstv %s1652_s22 }
 0x19e   :  { %v570_v40 = vadd.f32 %v1603_v53, %v555_v38  ;;  %v1001_v42 = vmul.f32 %v1000_v37, %v1303_v3  ;;  %v569_v43 = vadd.f32 %v566_v26, %v554_v29 }
 0x19f   :  { %968 = vrot.lane.b32.xlu0 %v963_v14, %s1250_s21  ;;  %966 = vrot.lane.b32.xlu1 %v962_v15, %s1250_s21  ;;  %s1689_s21 = sld [smem:[#allocation7 + $0x3]] }
 0x1a0   :  { %v638_v17 = vpop.permute.xlu1 %637  ;;  %v640_v18 = vpop.permute.xlu0 %639  ;;  %v585_v44 = vadd.f32 %v1610_v55, %v570_v40  ;;  %v584_v46 = vadd.f32 %v581_v41, %v569_v43  ;;  %v626_v55 = vsel %vm104_vm3, %v623_v7, %v1640_v8 }
 0x1a1   :  { %v723_v53 = vstv %s1668_s24  ;;  %v641_v21 = vsel %vm298_vm14, %v638_v17, %v640_v18  ;;  %vm1798_vm14 = vcmask 1047592  }
 0x1a2   :  { %v600_v50 = vadd.f32 %v1614_v57, %v585_v44  ;;  %v599_v52 = vadd.f32 %v596_v45, %v584_v46  ;;  %v725_v30 = vmul.f32 %v723_v53, %v1305_v4  ;;  %v736_v57 = vsel %vm72_vm1, %v1616_v58, %v1618_v59 }
 0x1a3   :  { %981 = vrot.lane.b32.xlu0 %v976_v19, %s1251_s1  ;;  %979 = vrot.lane.b32.xlu1 %v975_v20, %s1251_s1  ;;  %v724_v63 = vmul.f32 %v723_v53, %v1303_v3 }
 0x1a4   :  { %v778_v24 = vpop.permute.xlu1 %777  ;;  %v1660_v28 = vpop.permute.xlu0 %779  ;;  %v615_v54 = vadd.f32 %v1626_v27, %v600_v50  ;;  %v614_v56 = vadd.f32 %v611_v51, %v599_v52  ;;  %v740_v2 = vadd.f32 %v1618_v59, %v725_v30  ;;  %v766_v59 = vsel %vm104_vm3, %v1646_v12, %v1648_v13 }
 0x1a5   :  { %v739_v9 = vadd.f32 %v736_v57, %v724_v63  ;;  %s692_s1 = ssub.f32 0.0, %s1689_s21 }
 0x1a6   :  { %v630_v62 = vadd.f32 %v1640_v8, %v615_v54  ;;  %v629_v27 = vadd.f32 %v626_v55, %v614_v56  ;;  %v755_v8 = vadd.f32 %v1634_v1, %v740_v2  ;;  %v880_v55 = vstv %s1725_s15 }
 0x1a7   :  { %994 = vrot.lane.b32.xlu0 %v989_v34, %s1252_s27  ;;  %992 = vrot.lane.b32.xlu1 %v988_v35, %s1252_s27  ;;  %s1712_s27 = sld [smem:[#allocation7 + $0x4]]  ;;  %v754_v0 = vadd.f32 %v751_v5, %v739_v9  ;;  %v693_v32 = vstv %s692_s1 }
 0x1a8   :  { %v653_v31 = vpop.permute.xlu1 %652  ;;  %v655_v39 = vpop.permute.xlu0 %654  ;;  %v645_v6 = vadd.f32 %v640_v18, %v630_v62  ;;  %v644_v10 = vadd.f32 %v641_v21, %v629_v27  ;;  %v770_v17 = vadd.f32 %v1648_v13, %v755_v8  ;;  %v781_v18 = vsel %vm120_vm4, %v778_v24, %v1660_v28 }
 0x1a9   :  { %v656_v7 = vsel %vm120_vm4, %v653_v31, %v655_v39  ;;  %v769_v20 = vadd.f32 %v766_v59, %v754_v0  ;;  %v881_v21 = vmul.f32 %v880_v55, %v1303_v3 }
 0x1aa   :  { %v660_v14 = vadd.f32 %v655_v39, %v645_v6  ;;  %v659_v16 = vadd.f32 %v656_v7, %v644_v10  ;;  %v785_v33 = vadd.f32 %v1660_v28, %v770_v17 }
 0x1ab   :  { %1005 = vrot.lane.b32.xlu0 %v1001_v42, %s1253_s30  ;;  %v784_v13 = vadd.f32 %v781_v18, %v769_v20 }
 0x1ac   :  { %v793_v47 = vpop.permute.xlu1 %792  ;;  %v795_v48 = vpop.permute.xlu0 %794 }
 0x1ad   :  { %v796_v12 = vsel %vm136_vm5, %v793_v47, %v795_v48  ;;  %v800_v38 = vadd.f32 %v795_v48, %v785_v33  ;;  %s847_s17 = ssub.f32 0.0, %s1712_s27 }
 0x1ae   :  { %v799_v29 = vadd.f32 %v796_v12, %v784_v13 }
 0x1af   :  { %v848_v51 = vstv %s847_s17 }
 0x1b0   :  { %v668_v60 = vpop.permute.xlu1 %667  ;;  %v670_v61 = vpop.permute.xlu0 %669 }
 0x1b1   :  { %v671_v15 = vsel %vm329_vm15, %v668_v60, %v670_v61  ;;  %v675_v19 = vadd.f32 %v670_v61, %v660_v14  ;;  %vm868_vm15 = vcmask 15360   ;;  %v1002_v60 = vmul.f32 %v1000_v37, %v1305_v4 }
 0x1b2   :  { %v674_v22 = vadd.f32 %v671_v15, %v659_v16 }
 0x1b4   :  { %v808_v11 = vpop.permute.xlu1 %807  ;;  %v810_v58 = vpop.permute.xlu0 %809 }
 0x1b5   :  { %v811_v24 = vsel %vm152_vm6, %v808_v11, %v810_v58  ;;  %v815_v41 = vadd.f32 %v810_v58, %v800_v38 }
 0x1b6   :  { %v814_v45 = vadd.f32 %v811_v24, %v799_v29 }
 0x1b8   :  { %v683_v23 = vpop.permute.xlu1 %682  ;;  %v685_v1 = vpop.permute.xlu0 %684 }
 0x1b9   :  { %v686_v34 = vsel %vm136_vm5, %v683_v23, %v685_v1  ;;  %v690_v35 = vadd.f32 %v685_v1, %v675_v19 }
 0x1ba   :  { %v689_v36 = vadd.f32 %v686_v34, %v674_v22 }
 0x1bb   :  { %vm695_vm11 = vcmp.gt.f32.partialorder %v690_v35, %v693_v32  ;;  %v1729_v26 = vsel %vm372_vm0, %v690_v35, -inf  ;;  %vm866_vm0 = vcmask 1047568  }
 0x1bc   :  { %vm694_vm12 = vcmp.gt.f32.partialorder %v689_v36, %v693_v32  ;;  %v1094_v28 = vsel %vm695_vm11, 1.0, %v1254_v25  ;;  %v711_v31 = vsel %vm1798_vm14, %v689_v36, -inf  ;;  %v823_v39 = vpop.permute.xlu1 %822  ;;  %v825_v40 = vpop.permute.xlu0 %824 }
 0x1bd   :  { %v1093_v42 = vsel %vm694_vm12, 1.0, %v1254_v25  ;;  %v826_v43 = vsel %vm474_vm10, %v823_v39, %v825_v40  ;;  %v713_v44 = vmax.f32 %v711_v31, %v1729_v26  ;;  %v830_v47 = vadd.f32 %v825_v40, %v815_v41 }
 0x1be   :  { %v1151_v46 = vpack.i.bf16 %v1094_v28, %v1093_v42  ;;  %v829_v48 = vadd.f32 %v826_v43, %v814_v45 }
 0x1c0   :  { %v838_v50 = vpop.permute.xlu1 %837  ;;  %v840_v52 = vpop.permute.xlu0 %839  ;;  %1152 = vrot.lane.b32.xlu1 %v1151_v46, %s1247_s4  ;;  %s1750_s4 = sld [smem:[#allocation7 + $0x2]] }
 0x1c1   :  { %v841_v53 = vsel %vm488_vm8, %v838_v50, %v840_v52  ;;  %v845_v54 = vadd.f32 %v840_v52, %v830_v47 }
 0x1c2   :  { %v844_v56 = vadd.f32 %v841_v53, %v829_v48 }
 0x1c3   :  { %vm850_vm11 = vcmp.gt.f32.partialorder %v845_v54, %v848_v51  ;;  %v869_v61 = vsel %vm868_vm15, %v845_v54, -inf  ;;  %vm1025_vm15 = vcmask 89168  }
 0x1c4   :  { %vm849_vm12 = vcmp.gt.f32.partialorder %v844_v56, %v848_v51  ;;  %v1106_v30 = vsel %vm850_vm11, 1.0, %v1254_v25  ;;  %v867_v57 = vsel %vm866_vm0, %v844_v56, -inf  ;;  %v889_v62 = vpop.permute.xlu1 %888  ;;  %v891_v63 = vpop.permute.xlu0 %890  ;;  %1007 = vrot.lane.b32.xlu1 %v1002_v60, %s1253_s30  ;;  %vm1027_vm0 = vcmask 97368  }
 0x1c5   :  { %v1105_v27 = vsel %vm849_vm12, 1.0, %v1254_v25  ;;  %v892_v2 = vsel %vm72_vm1, %v889_v62, %v891_v63  ;;  %v870_v5 = vmax.f32 %v867_v57, %v869_v61 }
 0x1c6   :  { %v1156_v6 = vpack.i.bf16 %v1106_v30, %v1105_v27  ;;  %v894_v7 = vadd.f32 %v892_v2, %v881_v21  ;;  %s521_s19 = ssub.f32 0.0, %s1750_s4 }
 0x1c8   :  { %v902_v4 = vpop.permute.xlu1 %901  ;;  %1157 = vrot.lane.b32.xlu0 %v1156_v6, %s1239_s14  ;;  %v904_v37 = vpop.permute.xlu0 %903  ;;  %v522_v11 = vstv %s521_s19  ;;  %s1767_s14 = sld [smem:[#allocation7 + $0x5]] }
 0x1c9   :  { %v905_v9 = vsel %vm88_vm2, %v902_v4, %v904_v37  ;;  %vm523_vm14 = vcmp.gt.f32.partialorder %v1597_v49, %v522_v11 }
 0x1ca   :  { %v907_v10 = vadd.f32 %v905_v9, %v894_v7  ;;  %v1080_v16 = vsel %vm523_vm14, 1.0, %v1254_v25  ;;  %v377_v7 = vstv %s1532_s9 }
 0x1cc   :  { %v915_v3 = vpop.permute.xlu1 %914  ;;  %v1148_v8 = vpop.permute.xlu0 %1147 }
 0x1cd   :  { %v1150_v15 = vunpack.i.h.bf16 %v1148_v8  ;;  %v1149_v0 = vunpack.i.l.bf16 %v1148_v8 }
 0x1ce   :  { %s1013_s30 = ssub.f32 0.0, %s1767_s14 }
 0x1cf   :  { %v365_v18 = vsel %vm267_vm13, %v1149_v0, %v1150_v15 }
 0x1d0   :  { %v1143_v58 = vpop.permute.xlu1 %1142  ;;  %v1014_v62 = vstv %s1013_s30 }
 0x1d1   :  { %v1145_v59 = vunpack.i.h.bf16 %v1143_v58  ;;  %v1144_v14 = vunpack.i.l.bf16 %v1143_v58 }
 0x1d3   :  { %v173_v17 = vsel %vm88_vm2, %v1144_v14, %v1145_v59  ;;  %v716_v14 = vstv %s1689_s21 }
 0x1e7   :  { %529 = vmax.xlane.f32.xlu0 %v1597_v49 }
 0x1e8   :  { %526 = vadd.xlane.f32.xlu1 %v1080_v16  ;;  %v873_v16 = vstv %s1712_s27 }
 0x1eb   :  { %175 = vadd.xlane.f32.xlu0 %v173_v17 }
 0x1ec   :  { %367 = vadd.xlane.f32.xlu1 %v365_v18 }
 0x1f0   :  { %714 = vmax.xlane.f32.xlu1 %v713_v44 }
 0x1f4   :  { %871 = vmax.xlane.f32.xlu1 %v870_v5  ;;  %v185_v5 = vstv %s1435_s10  ;;  %s1255_s10 = smov [#allocation9]  }
 0x1f5   :  { %s1035_s23 = sshll.u32 %s1255_s10, 4  ;;  %s1036_s23 = int_to_ptr.vmem [resolvable:$true] %s1035_s23 }
 0x1f6   :  { %s1205_s6 = scalar_lea.vmem %s1036_s23, 128  ;;  %p1210_p3 = scmp.lt.s32.totalorder %s1036_s23, %s1036_s23 }
 0x1f7   :  { %p1206_p2 = scmp.ne.s32.totalorder %s1036_s23, %s1205_s6  ;;  %p1211_p4 = scmp.lt.s32.totalorder %s1205_s6, %s1205_s6 }
 0x1f9   :  { %p1212_p5 = por %p1211_p4, %p1210_p3 }
 0x1fb   :  { %p1213_p6 = pnand %p1212_p5, %p1206_p2 }
 0x206   :  { %v1758_v19 = vpop.xlane.xlu0 %375 }
 0x207   :  { %v378_v11 = vadd.f32 %v377_v7, %v1758_v19  ;;  %v1023_v19 = vstv %s1767_s14 }
 0x20a   :  { %v917_v20 = vpop.permute.xlu0 %916 }
 0x20b   :  { %v918_v22 = vsel %vm104_vm3, %v915_v3, %v917_v20  ;;  %vm187_vm3 = vcmask 7168   ;;  %v531_v3 = vstv %s1750_s4 }
 0x20c   :  { %v920_v23 = vadd.f32 %v918_v22, %v907_v10 }
 0x20e   :  { %v930_v1 = vpop.permute.xlu0 %929 }
 0x20f   :  { %v184_v32 = vpop.xlane.xlu1 %183 }
 0x210   :  { %v186_v9 = vadd.f32 %v185_v5, %v184_v32 }
 0x212   :  { %v943_v12 = vpop.permute.xlu0 %942 }
 0x213   :  { %v928_v49 = vpop.permute.xlu1 %927 }
 0x214   :  { %v931_v24 = vsel %vm120_vm4, %v928_v49, %v930_v1  ;;  %vm189_vm4 = vcmask 15368  }
 0x215   :  { %v933_v28 = vadd.f32 %v931_v24, %v920_v23 }
 0x216   :  { %v956_v35 = vpop.permute.xlu0 %955 }
 0x217   :  { %v941_v33 = vpop.permute.xlu1 %940 }
 0x218   :  { %v944_v29 = vsel %vm136_vm5, %v941_v33, %v943_v12  ;;  %vm381_vm5 = vcmask 31768  }
 0x219   :  { %v946_v39 = vadd.f32 %v944_v29, %v933_v28 }
 0x21a   :  { %v969_v36 = vpop.permute.xlu0 %968 }
 0x21b   :  { %v954_v34 = vpop.permute.xlu1 %953 }
 0x21c   :  { %v957_v31 = vsel %vm152_vm6, %v954_v34, %v956_v35  ;;  %vm533_vm6 = vcmask 39968  }
 0x21d   :  { %v959_v42 = vadd.f32 %v957_v31, %v946_v39 }
 0x21e   :  { %v982_v26 = vpop.permute.xlu0 %981 }
 0x21f   :  { %v967_v13 = vpop.permute.xlu1 %966 }
 0x220   :  { %v970_v41 = vsel %vm474_vm10, %v967_v13, %v969_v36  ;;  %vm720_vm10 = vcmask 64568  }
 0x221   :  { %v972_v45 = vadd.f32 %v970_v41, %v959_v42 }
 0x222   :  { %v995_v43 = vpop.permute.xlu0 %994 }
 0x223   :  { %v980_v38 = vpop.permute.xlu1 %979 }
 0x224   :  { %v983_v44 = vsel %vm488_vm8, %v980_v38, %v982_v26  ;;  %vm875_vm8 = vcmask 72768  }
 0x225   :  { %v985_v48 = vadd.f32 %v983_v44, %v972_v45 }
 0x226   :  { %v1006_v50 = vpop.permute.xlu0 %1005 }
 0x227   :  { %v993_v40 = vpop.permute.xlu1 %992 }
 0x228   :  { %v996_v47 = vsel %vm502_vm9, %v993_v40, %v995_v43  ;;  %vm877_vm9 = vcmask 80968  }
 0x229   :  { %v998_v51 = vadd.f32 %v996_v47, %v985_v48 }
 0x232   :  { %v1153_v46 = vpop.permute.xlu1 %1152 }
 0x233   :  { %v1155_v61 = vunpack.i.h.bf16 %v1153_v46  ;;  %v1154_v30 = vunpack.i.l.bf16 %v1153_v46 }
 0x235   :  { %v706_v21 = vsel %vm267_vm13, %v1154_v30, %v1155_v61  ;;  %vm535_vm13 = vcmask 48168  }
 0x236   :  { %v1008_v52 = vpop.permute.xlu1 %1007 }
 0x237   :  { %v1009_v53 = vsel %vm516_vm7, %v1006_v50, %v1008_v52  ;;  %vm718_vm7 = vcmask 56368  }
 0x238   :  { %v1011_v54 = vadd.f32 %v1009_v53, %v998_v51 }
 0x23a   :  { %v1158_v55 = vpop.permute.xlu0 %1157  ;;  %1021 = vmax.xlane.f32.xlu1 %v1011_v54  ;;  %vm1015_vm2 = vcmp.gt.f32.partialorder %v1011_v54, %v1014_v62 }
 0x23b   :  { %v1160_v56 = vunpack.i.h.bf16 %v1158_v55  ;;  %v1159_v60 = vunpack.i.l.bf16 %v1158_v55  ;;  %v1119_v63 = vsel %vm1015_vm2, 1.0, %v1254_v25 }
 0x23d   :  { %v861_v57 = vsel %vm72_vm1, %v1159_v60, %v1160_v56  ;;  %vm379_vm1 = vcmask 23568  }
 0x23e   :  { %863 = vadd.xlane.f32.xlu0 %v861_v57 }
 0x242   :  { %708 = vadd.xlane.f32.xlu0 %v706_v21 }
 0x246   :  { %1018 = vadd.xlane.f32.xlu0 %v1119_v63 }
 0x274   :  { %v530_v27 = vpop.xlane.xlu0 %529 }
 0x275   :  { %v527_v2 = vpop.xlane.xlu1 %526  ;;  %v532_v58 = vadd.f32 %v531_v3, %v530_v27 }
 0x276   :  { %v528_v25 = vmul.f32 0.0078125, %v527_v2 }
 0x278   :  { %v176_v6 = vpop.xlane.xlu0 %175 }
 0x279   :  { %v177_v4 = vmul.f32 0.0078125, %v176_v6  ;;  %v368_v37 = vpop.xlane.xlu1 %367 }
 0x27a   :  { %v369_v10 = vmul.f32 0.0078125, %v368_v37 }
 0x27b   :  { %188 = vst.msk [vmem:[#allocation9] sm:$0xff] %vm187_vm3, %v177_v4 }
 0x27c   :  { %190 = vst.msk [vmem:[#allocation9] sm:$0xff] %vm189_vm4, %v186_v9 }
 0x27d   :  { %380 = vst.msk [vmem:[#allocation9] sm:$0xff] %vm379_vm1, %v369_v10  ;;  %v715_v8 = vpop.xlane.xlu1 %714 }
 0x27e   :  { %382 = vst.msk [vmem:[#allocation9] sm:$0xff] %vm381_vm5, %v378_v11  ;;  %v717_v18 = vadd.f32 %v716_v14, %v715_v8 }
 0x27f   :  { %534 = vst.msk [vmem:[#allocation9] sm:$0xff] %vm533_vm6, %v528_v25 }
 0x280   :  { %536 = vst.msk [vmem:[#allocation9] sm:$0xff] %vm535_vm13, %v532_v58 }
 0x281   :  { %v872_v15 = vpop.xlane.xlu1 %871 }
 0x282   :  { %v874_v23 = vadd.f32 %v873_v16, %v872_v15 }
 0x2c7   :  { %v1022_v20 = vpop.xlane.xlu1 %1021 }
 0x2c8   :  { %v1024_v49 = vadd.f32 %v1023_v19, %v1022_v20 }
 0x2cb   :  { %v864_v59 = vpop.xlane.xlu0 %863 }
 0x2cc   :  { %v865_v22 = vmul.f32 0.0078125, %v864_v59 }
 0x2cf   :  { %v709_v0 = vpop.xlane.xlu0 %708 }
 0x2d0   :  { %v710_v17 = vmul.f32 0.0078125, %v709_v0 }
 0x2d2   :  { %719 = vst.msk [vmem:[#allocation9] sm:$0xff] %vm718_vm7, %v710_v17 }
 0x2d3   :  { %721 = vst.msk [vmem:[#allocation9] sm:$0xff] %vm720_vm10, %v717_v18  ;;  %v1019_v32 = vpop.xlane.xlu0 %1018 }
 0x2d4   :  { %v1020_v1 = vmul.f32 0.0078125, %v1019_v32  ;;  %876 = vst.msk [vmem:[#allocation9] sm:$0xff] %vm875_vm8, %v865_v22 }
 0x2d5   :  { %878 = vst.msk [vmem:[#allocation9] sm:$0xff] %vm877_vm9, %v874_v23 }
 0x2d6   :  { %1026 = vst.msk [vmem:[#allocation9] sm:$0xff] %vm1025_vm15, %v1020_v1 }
 0x2d7   :  { %1028 = vst.msk [vmem:[#allocation9] sm:$0xff] %vm1027_vm0, %v1024_v49 }
 0x2d8   :  { %1216 = shalt.err (!%p1213_p6)
}
 0x2d9   :  { %s1217_s5 = scalar_lea.hbm %s1796_s3, 128 }
 0x2da   :  { %p1218_p7 = scmp.ne.s32.totalorder %s1796_s3, %s1217_s5  ;;  %p1221_p8 = scmp.lt.u32.totalorder %s1217_s5, %s1796_s3 }
 0x2dc   :  { %p1223_p9 = pnand %p1221_p8, %p1218_p7 }
 0x2de   :  { %1226 = shalt.err (!%p1223_p9)
}
 0x2df   :  { %1038 = dma.vmem_to_hbm [thread:$0]  %s1036_s23, 128, %s1796_s3, [#allocation4]  }
 0x2e0   :  { %1233 = dma.done.wait [#allocation4], 128  }
 0x2e1   :  { %1234 = vsyncadd [#allocation4], 4294967168 }
 0x2e2   :  { %1042 = vsyncpa [#allocation3], 1 }
 0x2e3   :  { %1043 = vsyncpa [#allocation4], 1 }
 0x2e4   :  { %1044 = vsyncpa [#allocation5], 1 }
 0x2e5   :  { %1045 = vsyncpa [#allocation6], 1 }

</bundles_post_ra>
